<compile_context>
chip_gen: v6e
topology: v6e:2x2x1
jax: 0.10.0
libtpu: 0.0.40
codegen_flags: <defaults>
</compile_context>

<pallas_src>
import functools
import math

import jax
import jax.numpy as jnp
from jax.experimental import pallas as pl
from jax.experimental.pallas import tpu as pltpu

_LN_EPS = 1e-5

_PARAM_ORDER = ("wq", "bq", "wk", "bk", "wv", "bv", "wo", "bo",
                "lnp_g", "lnp_b", "wg", "bg", "w1", "b1", "w2", "b2",
                "lnc_g", "lnc_b")


# ----------------------------- Pallas kernel ---------------------------------

def _layernorm(x, gamma, beta, eps=_LN_EPS):
    mu = jnp.mean(x, axis=-1, keepdims=True)
    var = jnp.mean((x - mu) ** 2, axis=-1, keepdims=True)
    return (x - mu) * jax.lax.rsqrt(var + eps) * gamma + beta


def interstage_kernel(xp_ref, xc_ref,
                      wq_ref, bq_ref, wk_ref, bk_ref, wv_ref, bv_ref,
                      wo_ref, bo_ref,
                      lnp_g_ref, lnp_b_ref,
                      wg_ref, bg_ref, w1_ref, b1_ref, w2_ref, b2_ref,
                      lnc_g_ref, lnc_b_ref,
                      xp_out_ref, xc_out_ref,
                      *, num_heads):
    Bt, S, D = xp_ref.shape
    dh = D // num_heads
    scale = 1.0 / math.sqrt(dh)
    mxu_dtype = wq_ref.dtype          # weights arrive pre-cast (bf16 by default)

    # Residual / LN / softmax / activation math in f32; MXU operands in mxu_dtype.
    xp = xp_ref[...].astype(jnp.float32).reshape(Bt * S, D)
    xc = xc_ref[...].astype(jnp.float32).reshape(Bt * S, D)
    xp_m = xp.astype(mxu_dtype)
    xc_m = xc.astype(mxu_dtype)

    def mm(a, w_ref, b_ref):
        # Weights are already in the MXU dtype; accumulate in f32, bias in f32.
        return (jnp.dot(a, w_ref[...], preferred_element_type=jnp.float32)
                + b_ref[...])

    # --- InterstageAttention: Q from x_prev, K/V from x_curr (M = Bt*S rows) --
    # 1/sqrt(dh) folded into Q once; q/k/v cast to MXU dtype once (not per head).
    q = (mm(xp_m, wq_ref, bq_ref) * scale).reshape(Bt, S, D).astype(mxu_dtype)
    k = mm(xc_m, wk_ref, bk_ref).reshape(Bt, S, D).astype(mxu_dtype)
    v = mm(xc_m, wv_ref, bv_ref).reshape(Bt, S, D).astype(mxu_dtype)

    # Per-head attention; head outputs are folded straight into the output
    # projection so the lane-dense (R, D) result is built by f32 adds — no
    # concatenate, no masked lane sub-stores, no VMEM scratch round trip.
    att_acc = jnp.zeros((Bt * S, D), jnp.float32)
    for h in range(num_heads):
        sl = slice(h * dh, (h + 1) * dh)
        qh, kh, vh = q[:, :, sl], k[:, :, sl], v[:, :, sl]
        s = jnp.einsum('bqd,bkd->bqk', qh, kh,
                       preferred_element_type=jnp.float32)
        s = s - jnp.max(s, axis=-1, keepdims=True)
        e = jnp.exp(s)
        inv = pl.reciprocal(jnp.sum(e, axis=-1, keepdims=True), approx=True)
        p = (e * inv).astype(mxu_dtype)
        o_h = jnp.einsum('bqk,bkd->bqd', p, vh,
                         preferred_element_type=jnp.float32)
        att_acc = att_acc + jnp.dot(
            o_h.reshape(Bt * S, dh).astype(mxu_dtype), wo_ref[sl, :],
            preferred_element_type=jnp.float32)
    att_out = att_acc + bo_ref[...]

    # --- residual + LayerNorm (prev branch) ----------------------------------
    xp_n = _layernorm(xp + att_out, lnp_g_ref[...], lnp_b_ref[...])

    # --- GatedMechanism: sigmoid gate from LN'd x_prev, FFN on x_curr --------
    gate = jax.nn.sigmoid(mm(xp_n.astype(mxu_dtype), wg_ref, bg_ref))
    h1 = jax.nn.gelu(mm(xc_m, w1_ref, b1_ref))          # tanh-approx GELU
    ffn = mm(h1.astype(mxu_dtype), w2_ref, b2_ref)
    mix_out = gate * ffn

    # --- residual + LayerNorm (curr branch) ----------------------------------
    xc_n = _layernorm(xc + mix_out, lnc_g_ref[...], lnc_b_ref[...])

    xp_out_ref[...] = xp_n.reshape(Bt, S, D).astype(xp_out_ref.dtype)
    xc_out_ref[...] = xc_n.reshape(Bt, S, D).astype(xc_out_ref.dtype)


# ------------------------------- wrapper --------------------------------------

def _vmem_capacity_bytes(default=64 << 20):
    """Physical VMEM capacity; conservative (v7x) default if the query fails."""
    try:
        cap = getattr(pltpu.get_tpu_info(), "vmem_capacity_bytes", None)
        if cap:
            return int(cap)
    except Exception:
        pass
    return default


def _pick_batch_tile(B, S, target_rows):
    """Batch block so Bt*S approaches a full MXU M slab, with >=2 grid steps."""
    bt = max(1, min(B, pl.cdiv(target_rows, S)))
    # v7x has 2 TensorCores and the batch axis is "parallel": keep >= 2 grid
    # steps so both cores get work (harmless on 1-TC v5e/v6e).
    bt = min(bt, max(1, B // 2))
    while B % bt:
        bt -= 1
    return bt


def interstage_block(x_prev, x_curr, params, num_heads,
                     mxu_dtype=jnp.bfloat16, batch_tile=None, target_rows=256):
    # target_rows=256 fills the v6e/v7x MXU M dimension; 128 is enough on v5e.
    B, S, D = x_prev.shape
    d_ff = params["w1"].shape[1]
    assert D % num_heads == 0

    # Ship matmul weights pre-cast to the MXU dtype (halves weight DMA / VMEM,
    # removes in-kernel weight casts); biases / LN params stay f32, lane axis.
    p = {}
    for k, v in params.items():
        p[k] = (v.reshape(1, -1).astype(jnp.float32) if v.ndim == 1
                else v.astype(mxu_dtype))

    Bt = batch_tile or _pick_batch_tile(B, S, target_rows)
    assert B % Bt == 0, "batch must be divisible by the batch tile"

    def const_spec(shape):
        idx = lambda b: (0,) * len(shape)
        try:
            # Weights never change across the grid -> single-buffer them.
            return pl.BlockSpec(shape, idx, pipeline_mode=pl.Buffered(1))
        except TypeError:
            return pl.BlockSpec(shape, idx)

    seq_spec = pl.BlockSpec((Bt, S, D), lambda b: (b, 0, 0))
    in_specs = [seq_spec, seq_spec] + [const_spec(p[k].shape) for k in _PARAM_ORDER]

    # VMEM budget: single-buffered weights + double-buffered I/O blocks +
    # in-kernel f32/bf16 temporaries (xp/xc, q/k/v, att acc, gate/ffn/mix,
    # h1, per-head score slabs), clamped to <= 3/4 of physical VMEM.
    R = Bt * S
    mxu_b = jnp.dtype(mxu_dtype).itemsize
    weight_bytes = sum(int(v.size) * v.dtype.itemsize for v in p.values())
    block_bytes = Bt * S * D * x_prev.dtype.itemsize
    temp_bytes = (12 * R * D * 4 + 5 * R * D * mxu_b
                  + 2 * R * d_ff * 4 + R * d_ff * mxu_b
                  + 4 * Bt * S * S * 4)
    needed = weight_bytes + 4 * 2 * block_bytes + temp_bytes + (4 << 20)
    vmem_limit = int(min(max(needed, 32 << 20),
                         (_vmem_capacity_bytes() * 3) // 4))

    kernel = functools.partial(interstage_kernel, num_heads=num_heads)

    return pl.pallas_call(
        kernel,
        out_shape=(jax.ShapeDtypeStruct((B, S, D), x_prev.dtype),
                   jax.ShapeDtypeStruct((B, S, D), x_curr.dtype)),
        grid_spec=pltpu.PrefetchScalarGridSpec(
            num_scalar_prefetch=0,
            grid=(B // Bt,),
            in_specs=in_specs,
            out_specs=[seq_spec, seq_spec],
        ),
        compiler_params=pltpu.CompilerParams(
            dimension_semantics=("parallel",),
            vmem_limit_bytes=vmem_limit),
    )(x_prev, x_curr, *[p[k] for k in _PARAM_ORDER])


# --------------------------- pure-JAX reference --------------------------------

def reference(x_prev, x_curr, p, num_heads):
    B, S, D = x_prev.shape
    dh = D // num_heads
    q = x_prev @ p["wq"] + p["bq"]
    k = x_curr @ p["wk"] + p["bk"]
    v = x_curr @ p["wv"] + p["bv"]
    q = q.reshape(B, S, num_heads, dh).transpose(0, 2, 1, 3)
    k = k.reshape(B, S, num_heads, dh).transpose(0, 2, 1, 3)
    v = v.reshape(B, S, num_heads, dh).transpose(0, 2, 1, 3)
    s = jnp.einsum("bhqd,bhkd->bhqk", q, k) / jnp.sqrt(jnp.float32(dh))
    a = jax.nn.softmax(s, axis=-1)
    o = jnp.einsum("bhqk,bhkd->bhqd", a, v).transpose(0, 2, 1, 3).reshape(B, S, D)
    att_out = o @ p["wo"] + p["bo"]

    def ln(x, g, b):
        mu = x.mean(-1, keepdims=True)
        var = ((x - mu) ** 2).mean(-1, keepdims=True)
        return (x - mu) / jnp.sqrt(var + _LN_EPS) * g + b

    xp = ln(x_prev + att_out, p["lnp_g"], p["lnp_b"])
    gate = jax.nn.sigmoid(xp @ p["wg"] + p["bg"])
    ffn = jax.nn.gelu(x_curr @ p["w1"] + p["b1"]) @ p["w2"] + p["b2"]
    xc = ln(x_curr + gate * ffn, p["lnc_g"], p["lnc_b"])
    return xp, xc


# --------------------------------- main ----------------------------------------

if __name__ == "__main__":
    # Small but lane-dense shapes: D and d_ff are multiples of 128.
    B, S, D, H, D_FF = 2, 8, 128, 4, 256

    key = jax.random.PRNGKey(0)
    ks = jax.random.split(key, 16)

    def w(k, shape):
        return (0.02 * jax.random.normal(k, shape)).astype(jnp.float32)

    params = {
        "wq": w(ks[0], (D, D)),     "bq": w(ks[1], (D,)),
        "wk": w(ks[2], (D, D)),     "bk": w(ks[3], (D,)),
        "wv": w(ks[4], (D, D)),     "bv": w(ks[5], (D,)),
        "wo": w(ks[6], (D, D)),     "bo": w(ks[7], (D,)),
        "lnp_g": jnp.ones((D,), jnp.float32),
        "lnp_b": jnp.zeros((D,), jnp.float32),
        "wg": w(ks[8], (D, D)),     "bg": w(ks[9], (D,)),
        "w1": w(ks[10], (D, D_FF)), "b1": w(ks[11], (D_FF,)),
        "w2": w(ks[12], (D_FF, D)), "b2": w(ks[13], (D,)),
        "lnc_g": jnp.ones((D,), jnp.float32),
        "lnc_b": jnp.zeros((D,), jnp.float32),
    }

    x_prev = jax.random.normal(ks[14], (B, S, D), jnp.float32)
    x_curr = jax.random.normal(ks[15], (B, S, D), jnp.float32)

    xp_gold, xc_gold = reference(x_prev, x_curr, params, num_heads=H)

    # Default path: bf16 MXU operands, f32 accumulation / LN / softmax / acts.
    xp_bf, xc_bf = interstage_block(x_prev, x_curr, params, num_heads=H)
    jax.block_until_ready((xp_bf, xc_bf))
    assert jnp.allclose(xp_bf, xp_gold, atol=5e-2, rtol=5e-2)
    assert jnp.allclose(xc_bf, xc_gold, atol=5e-2, rtol=5e-2)

    # f32 MXU operand path; tight tolerance.
    xp_out, xc_out = interstage_block(x_prev, x_curr, params, num_heads=H,
                                      mxu_dtype=jnp.float32)
    jax.block_until_ready((xp_out, xc_out))
    assert jnp.allclose(xp_out, xp_gold, atol=2e-3, rtol=2e-3)
    assert jnp.allclose(xc_out, xc_gold, atol=2e-3, rtol=2e-3)

    print("KERNEL_OK")
</pallas_src>

<mosaic_0001>
module attributes {stable_mosaic.version = 11 : i64} {
  func.func @interstage_kernel(%arg0: i32, %arg1: memref<1x8x128xf32, #tpu.memory_space<vmem>>, %arg2: memref<1x8x128xf32, #tpu.memory_space<vmem>>, %arg3: memref<128x128xbf16, #tpu.memory_space<vmem>>, %arg4: memref<1x128xf32, #tpu.memory_space<vmem>>, %arg5: memref<128x128xbf16, #tpu.memory_space<vmem>>, %arg6: memref<1x128xf32, #tpu.memory_space<vmem>>, %arg7: memref<128x128xbf16, #tpu.memory_space<vmem>>, %arg8: memref<1x128xf32, #tpu.memory_space<vmem>>, %arg9: memref<128x128xbf16, #tpu.memory_space<vmem>>, %arg10: memref<1x128xf32, #tpu.memory_space<vmem>>, %arg11: memref<1x128xf32, #tpu.memory_space<vmem>>, %arg12: memref<1x128xf32, #tpu.memory_space<vmem>>, %arg13: memref<128x128xbf16, #tpu.memory_space<vmem>>, %arg14: memref<1x128xf32, #tpu.memory_space<vmem>>, %arg15: memref<128x256xbf16, #tpu.memory_space<vmem>>, %arg16: memref<1x256xf32, #tpu.memory_space<vmem>>, %arg17: memref<256x128xbf16, #tpu.memory_space<vmem>>, %arg18: memref<1x128xf32, #tpu.memory_space<vmem>>, %arg19: memref<1x128xf32, #tpu.memory_space<vmem>>, %arg20: memref<1x128xf32, #tpu.memory_space<vmem>>, %arg21: memref<1x8x128xf32, #tpu.memory_space<vmem>>, %arg22: memref<1x8x128xf32, #tpu.memory_space<vmem>>) attributes {dimension_semantics = [#tpu.dimension_semantics<parallel>], iteration_bounds = array<i64: 2>, scalar_prefetch = 0 : i64, scratch_operands = 0 : i64, tpu.core_type = #tpu.core_type<tc>, window_params = [{transform_indices = @transform_0, window_bounds = array<i64: 1, 8, 128>}, {transform_indices = @transform_1, window_bounds = array<i64: 1, 8, 128>}, {pipeline_mode = #tpu.pipeline_mode<synchronous>, transform_indices = @transform_2, window_bounds = array<i64: 128, 128>}, {pipeline_mode = #tpu.pipeline_mode<synchronous>, transform_indices = @transform_3, window_bounds = array<i64: 1, 128>}, {pipeline_mode = #tpu.pipeline_mode<synchronous>, transform_indices = @transform_4, window_bounds = array<i64: 128, 128>}, {pipeline_mode = #tpu.pipeline_mode<synchronous>, transform_indices = @transform_5, window_bounds = array<i64: 1, 128>}, {pipeline_mode = #tpu.pipeline_mode<synchronous>, transform_indices = @transform_6, window_bounds = array<i64: 128, 128>}, {pipeline_mode = #tpu.pipeline_mode<synchronous>, transform_indices = @transform_7, window_bounds = array<i64: 1, 128>}, {pipeline_mode = #tpu.pipeline_mode<synchronous>, transform_indices = @transform_8, window_bounds = array<i64: 128, 128>}, {pipeline_mode = #tpu.pipeline_mode<synchronous>, transform_indices = @transform_9, window_bounds = array<i64: 1, 128>}, {pipeline_mode = #tpu.pipeline_mode<synchronous>, transform_indices = @transform_10, window_bounds = array<i64: 1, 128>}, {pipeline_mode = #tpu.pipeline_mode<synchronous>, transform_indices = @transform_11, window_bounds = array<i64: 1, 128>}, {pipeline_mode = #tpu.pipeline_mode<synchronous>, transform_indices = @transform_12, window_bounds = array<i64: 128, 128>}, {pipeline_mode = #tpu.pipeline_mode<synchronous>, transform_indices = @transform_13, window_bounds = array<i64: 1, 128>}, {pipeline_mode = #tpu.pipeline_mode<synchronous>, transform_indices = @transform_14, window_bounds = array<i64: 128, 256>}, {pipeline_mode = #tpu.pipeline_mode<synchronous>, transform_indices = @transform_15, window_bounds = array<i64: 1, 256>}, {pipeline_mode = #tpu.pipeline_mode<synchronous>, transform_indices = @transform_16, window_bounds = array<i64: 256, 128>}, {pipeline_mode = #tpu.pipeline_mode<synchronous>, transform_indices = @transform_17, window_bounds = array<i64: 1, 128>}, {pipeline_mode = #tpu.pipeline_mode<synchronous>, transform_indices = @transform_18, window_bounds = array<i64: 1, 128>}, {pipeline_mode = #tpu.pipeline_mode<synchronous>, transform_indices = @transform_19, window_bounds = array<i64: 1, 128>}, {transform_indices = @transform_20, window_bounds = array<i64: 1, 8, 128>}, {transform_indices = @transform_21, window_bounds = array<i64: 1, 8, 128>}]} {
    %c0 = arith.constant 0 : index
    %c0_0 = arith.constant 0 : index
    %c0_1 = arith.constant 0 : index
    %0 = vector.load %arg1[%c0, %c0_0, %c0_1] : memref<1x8x128xf32, #tpu.memory_space<vmem>>, vector<1x8x128xf32>
    %1 = vector.shape_cast %0 : vector<1x8x128xf32> to vector<8x128xf32>
    %c0_2 = arith.constant 0 : index
    %c0_3 = arith.constant 0 : index
    %c0_4 = arith.constant 0 : index
    %2 = vector.load %arg2[%c0_2, %c0_3, %c0_4] : memref<1x8x128xf32, #tpu.memory_space<vmem>>, vector<1x8x128xf32>
    %3 = vector.shape_cast %2 : vector<1x8x128xf32> to vector<8x128xf32>
    %4 = arith.truncf %1 : vector<8x128xf32> to vector<8x128xbf16>
    %5 = arith.truncf %3 : vector<8x128xf32> to vector<8x128xbf16>
    %c0_5 = arith.constant 0 : index
    %c0_6 = arith.constant 0 : index
    %6 = vector.load %arg3[%c0_5, %c0_6] : memref<128x128xbf16, #tpu.memory_space<vmem>>, vector<128x128xbf16>
    %cst = arith.constant dense<0.000000e+00> : vector<8x128xf32>
    %7 = tpu.matmul %4, %6, %cst {dimension_numbers = #tpu.dot_dimension_numbers<[1], [0], [0], [1], [0, 0, 1, 1], [], []>} : vector<8x128xbf16>, vector<128x128xbf16>, vector<8x128xf32> -> vector<8x128xf32>
    %c0_7 = arith.constant 0 : index
    %c0_8 = arith.constant 0 : index
    %8 = vector.load %arg4[%c0_7, %c0_8] : memref<1x128xf32, #tpu.memory_space<vmem>>, vector<1x128xf32>
    %9 = vector.broadcast %8 : vector<1x128xf32> to vector<8x128xf32>
    %10 = arith.addf %7, %9 : vector<8x128xf32>
    %cst_9 = arith.constant 0.176776692 : f32
    %11 = vector.broadcast %cst_9 : f32 to vector<8x128xf32>
    %12 = arith.mulf %10, %11 : vector<8x128xf32>
    %13 = vector.shape_cast %12 : vector<8x128xf32> to vector<1x8x128xf32>
    %14 = arith.truncf %13 : vector<1x8x128xf32> to vector<1x8x128xbf16>
    %c0_10 = arith.constant 0 : index
    %c0_11 = arith.constant 0 : index
    %15 = vector.load %arg5[%c0_10, %c0_11] : memref<128x128xbf16, #tpu.memory_space<vmem>>, vector<128x128xbf16>
    %cst_12 = arith.constant dense<0.000000e+00> : vector<8x128xf32>
    %16 = tpu.matmul %5, %15, %cst_12 {dimension_numbers = #tpu.dot_dimension_numbers<[1], [0], [0], [1], [0, 0, 1, 1], [], []>} : vector<8x128xbf16>, vector<128x128xbf16>, vector<8x128xf32> -> vector<8x128xf32>
    %c0_13 = arith.constant 0 : index
    %c0_14 = arith.constant 0 : index
    %17 = vector.load %arg6[%c0_13, %c0_14] : memref<1x128xf32, #tpu.memory_space<vmem>>, vector<1x128xf32>
    %18 = vector.broadcast %17 : vector<1x128xf32> to vector<8x128xf32>
    %19 = arith.addf %16, %18 : vector<8x128xf32>
    %20 = vector.shape_cast %19 : vector<8x128xf32> to vector<1x8x128xf32>
    %21 = arith.truncf %20 : vector<1x8x128xf32> to vector<1x8x128xbf16>
    %c0_15 = arith.constant 0 : index
    %c0_16 = arith.constant 0 : index
    %22 = vector.load %arg7[%c0_15, %c0_16] : memref<128x128xbf16, #tpu.memory_space<vmem>>, vector<128x128xbf16>
    %cst_17 = arith.constant dense<0.000000e+00> : vector<8x128xf32>
    %23 = tpu.matmul %5, %22, %cst_17 {dimension_numbers = #tpu.dot_dimension_numbers<[1], [0], [0], [1], [0, 0, 1, 1], [], []>} : vector<8x128xbf16>, vector<128x128xbf16>, vector<8x128xf32> -> vector<8x128xf32>
    %c0_18 = arith.constant 0 : index
    %c0_19 = arith.constant 0 : index
    %24 = vector.load %arg8[%c0_18, %c0_19] : memref<1x128xf32, #tpu.memory_space<vmem>>, vector<1x128xf32>
    %25 = vector.broadcast %24 : vector<1x128xf32> to vector<8x128xf32>
    %26 = arith.addf %23, %25 : vector<8x128xf32>
    %27 = vector.shape_cast %26 : vector<8x128xf32> to vector<1x8x128xf32>
    %28 = arith.truncf %27 : vector<1x8x128xf32> to vector<1x8x128xbf16>
    %cst_20 = arith.constant 0.000000e+00 : f32
    %29 = vector.broadcast %cst_20 : f32 to vector<8x128xf32>
    %30 = vector.extract_strided_slice %14 {offsets = [0, 0, 0], sizes = [1, 8, 32], strides = [1, 1, 1]} : vector<1x8x128xbf16> to vector<1x8x32xbf16>
    %31 = vector.extract_strided_slice %21 {offsets = [0, 0, 0], sizes = [1, 8, 32], strides = [1, 1, 1]} : vector<1x8x128xbf16> to vector<1x8x32xbf16>
    %32 = vector.extract_strided_slice %28 {offsets = [0, 0, 0], sizes = [1, 8, 32], strides = [1, 1, 1]} : vector<1x8x128xbf16> to vector<1x8x32xbf16>
    "tpu.trace_start"() <{level = 10 : i32, message = "bqd,bkd->bqk"}> : () -> ()
    %cst_21 = arith.constant dense<0.000000e+00> : vector<1x8x8xf32>
    %33 = tpu.matmul %30, %31, %cst_21 {dimension_numbers = #tpu.dot_dimension_numbers<[2], [2], [1], [1], [0, 0, 0, 1, 1, 1], [0], [0]>} : vector<1x8x32xbf16>, vector<1x8x32xbf16>, vector<1x8x8xf32> -> vector<1x8x8xf32>
    "tpu.trace_stop"() : () -> ()
    %cst_22 = arith.constant dense<0xFF800000> : vector<1x8xf32>
    %34 = vector.multi_reduction <maximumf>, %33, %cst_22 [2] : vector<1x8x8xf32> to vector<1x8xf32>
    %35 = vector.shape_cast %34 : vector<1x8xf32> to vector<1x8x1xf32>
    %36 = vector.broadcast %35 : vector<1x8x1xf32> to vector<1x8x8xf32>
    %37 = arith.subf %33, %36 : vector<1x8x8xf32>
    %38 = math.exp %37 : vector<1x8x8xf32>
    %cst_23 = arith.constant dense<0.000000e+00> : vector<1x8xf32>
    %39 = vector.multi_reduction <add>, %38, %cst_23 [2] : vector<1x8x8xf32> to vector<1x8xf32>
    %40 = vector.shape_cast %39 : vector<1x8xf32> to vector<1x8x1xf32>
    %41 = tpu.reciprocal %40 {approx = true} : vector<1x8x1xf32> -> vector<1x8x1xf32>
    %42 = vector.broadcast %41 : vector<1x8x1xf32> to vector<1x8x8xf32>
    %43 = arith.mulf %38, %42 : vector<1x8x8xf32>
    %44 = arith.truncf %43 : vector<1x8x8xf32> to vector<1x8x8xbf16>
    "tpu.trace_start"() <{level = 10 : i32, message = "bqk,bkd->bqd"}> : () -> ()
    %cst_24 = arith.constant dense<0.000000e+00> : vector<1x8x32xf32>
    %45 = tpu.matmul %44, %32, %cst_24 {dimension_numbers = #tpu.dot_dimension_numbers<[2], [1], [1], [2], [0, 0, 0, 1, 1, 2], [0], [0]>} : vector<1x8x8xbf16>, vector<1x8x32xbf16>, vector<1x8x32xf32> -> vector<1x8x32xf32>
    "tpu.trace_stop"() : () -> ()
    %46 = vector.shape_cast %45 : vector<1x8x32xf32> to vector<8x32xf32>
    %47 = arith.truncf %46 : vector<8x32xf32> to vector<8x32xbf16>
    %c0_25 = arith.constant 0 : index
    %c0_26 = arith.constant 0 : index
    %48 = vector.load %arg9[%c0_25, %c0_26] : memref<128x128xbf16, #tpu.memory_space<vmem>>, vector<32x128xbf16>
    %cst_27 = arith.constant dense<0.000000e+00> : vector<8x128xf32>
    %49 = tpu.matmul %47, %48, %cst_27 {dimension_numbers = #tpu.dot_dimension_numbers<[1], [0], [0], [1], [0, 0, 1, 1], [], []>} : vector<8x32xbf16>, vector<32x128xbf16>, vector<8x128xf32> -> vector<8x128xf32>
    %50 = arith.addf %29, %49 : vector<8x128xf32>
    %51 = vector.extract_strided_slice %14 {offsets = [0, 0, 32], sizes = [1, 8, 32], strides = [1, 1, 1]} : vector<1x8x128xbf16> to vector<1x8x32xbf16>
    %52 = vector.extract_strided_slice %21 {offsets = [0, 0, 32], sizes = [1, 8, 32], strides = [1, 1, 1]} : vector<1x8x128xbf16> to vector<1x8x32xbf16>
    %53 = vector.extract_strided_slice %28 {offsets = [0, 0, 32], sizes = [1, 8, 32], strides = [1, 1, 1]} : vector<1x8x128xbf16> to vector<1x8x32xbf16>
    "tpu.trace_start"() <{level = 10 : i32, message = "bqd,bkd->bqk"}> : () -> ()
    %cst_28 = arith.constant dense<0.000000e+00> : vector<1x8x8xf32>
    %54 = tpu.matmul %51, %52, %cst_28 {dimension_numbers = #tpu.dot_dimension_numbers<[2], [2], [1], [1], [0, 0, 0, 1, 1, 1], [0], [0]>} : vector<1x8x32xbf16>, vector<1x8x32xbf16>, vector<1x8x8xf32> -> vector<1x8x8xf32>
    "tpu.trace_stop"() : () -> ()
    %cst_29 = arith.constant dense<0xFF800000> : vector<1x8xf32>
    %55 = vector.multi_reduction <maximumf>, %54, %cst_29 [2] : vector<1x8x8xf32> to vector<1x8xf32>
    %56 = vector.shape_cast %55 : vector<1x8xf32> to vector<1x8x1xf32>
    %57 = vector.broadcast %56 : vector<1x8x1xf32> to vector<1x8x8xf32>
    %58 = arith.subf %54, %57 : vector<1x8x8xf32>
    %59 = math.exp %58 : vector<1x8x8xf32>
    %cst_30 = arith.constant dense<0.000000e+00> : vector<1x8xf32>
    %60 = vector.multi_reduction <add>, %59, %cst_30 [2] : vector<1x8x8xf32> to vector<1x8xf32>
    %61 = vector.shape_cast %60 : vector<1x8xf32> to vector<1x8x1xf32>
    %62 = tpu.reciprocal %61 {approx = true} : vector<1x8x1xf32> -> vector<1x8x1xf32>
    %63 = vector.broadcast %62 : vector<1x8x1xf32> to vector<1x8x8xf32>
    %64 = arith.mulf %59, %63 : vector<1x8x8xf32>
    %65 = arith.truncf %64 : vector<1x8x8xf32> to vector<1x8x8xbf16>
    "tpu.trace_start"() <{level = 10 : i32, message = "bqk,bkd->bqd"}> : () -> ()
    %cst_31 = arith.constant dense<0.000000e+00> : vector<1x8x32xf32>
    %66 = tpu.matmul %65, %53, %cst_31 {dimension_numbers = #tpu.dot_dimension_numbers<[2], [1], [1], [2], [0, 0, 0, 1, 1, 2], [0], [0]>} : vector<1x8x8xbf16>, vector<1x8x32xbf16>, vector<1x8x32xf32> -> vector<1x8x32xf32>
    "tpu.trace_stop"() : () -> ()
    %67 = vector.shape_cast %66 : vector<1x8x32xf32> to vector<8x32xf32>
    %68 = arith.truncf %67 : vector<8x32xf32> to vector<8x32xbf16>
    %c32 = arith.constant 32 : index
    %c0_32 = arith.constant 0 : index
    %69 = vector.load %arg9[%c32, %c0_32] : memref<128x128xbf16, #tpu.memory_space<vmem>>, vector<32x128xbf16>
    %cst_33 = arith.constant dense<0.000000e+00> : vector<8x128xf32>
    %70 = tpu.matmul %68, %69, %cst_33 {dimension_numbers = #tpu.dot_dimension_numbers<[1], [0], [0], [1], [0, 0, 1, 1], [], []>} : vector<8x32xbf16>, vector<32x128xbf16>, vector<8x128xf32> -> vector<8x128xf32>
    %71 = arith.addf %50, %70 : vector<8x128xf32>
    %72 = vector.extract_strided_slice %14 {offsets = [0, 0, 64], sizes = [1, 8, 32], strides = [1, 1, 1]} : vector<1x8x128xbf16> to vector<1x8x32xbf16>
    %73 = vector.extract_strided_slice %21 {offsets = [0, 0, 64], sizes = [1, 8, 32], strides = [1, 1, 1]} : vector<1x8x128xbf16> to vector<1x8x32xbf16>
    %74 = vector.extract_strided_slice %28 {offsets = [0, 0, 64], sizes = [1, 8, 32], strides = [1, 1, 1]} : vector<1x8x128xbf16> to vector<1x8x32xbf16>
    "tpu.trace_start"() <{level = 10 : i32, message = "bqd,bkd->bqk"}> : () -> ()
    %cst_34 = arith.constant dense<0.000000e+00> : vector<1x8x8xf32>
    %75 = tpu.matmul %72, %73, %cst_34 {dimension_numbers = #tpu.dot_dimension_numbers<[2], [2], [1], [1], [0, 0, 0, 1, 1, 1], [0], [0]>} : vector<1x8x32xbf16>, vector<1x8x32xbf16>, vector<1x8x8xf32> -> vector<1x8x8xf32>
    "tpu.trace_stop"() : () -> ()
    %cst_35 = arith.constant dense<0xFF800000> : vector<1x8xf32>
    %76 = vector.multi_reduction <maximumf>, %75, %cst_35 [2] : vector<1x8x8xf32> to vector<1x8xf32>
    %77 = vector.shape_cast %76 : vector<1x8xf32> to vector<1x8x1xf32>
    %78 = vector.broadcast %77 : vector<1x8x1xf32> to vector<1x8x8xf32>
    %79 = arith.subf %75, %78 : vector<1x8x8xf32>
    %80 = math.exp %79 : vector<1x8x8xf32>
    %cst_36 = arith.constant dense<0.000000e+00> : vector<1x8xf32>
    %81 = vector.multi_reduction <add>, %80, %cst_36 [2] : vector<1x8x8xf32> to vector<1x8xf32>
    %82 = vector.shape_cast %81 : vector<1x8xf32> to vector<1x8x1xf32>
    %83 = tpu.reciprocal %82 {approx = true} : vector<1x8x1xf32> -> vector<1x8x1xf32>
    %84 = vector.broadcast %83 : vector<1x8x1xf32> to vector<1x8x8xf32>
    %85 = arith.mulf %80, %84 : vector<1x8x8xf32>
    %86 = arith.truncf %85 : vector<1x8x8xf32> to vector<1x8x8xbf16>
    "tpu.trace_start"() <{level = 10 : i32, message = "bqk,bkd->bqd"}> : () -> ()
    %cst_37 = arith.constant dense<0.000000e+00> : vector<1x8x32xf32>
    %87 = tpu.matmul %86, %74, %cst_37 {dimension_numbers = #tpu.dot_dimension_numbers<[2], [1], [1], [2], [0, 0, 0, 1, 1, 2], [0], [0]>} : vector<1x8x8xbf16>, vector<1x8x32xbf16>, vector<1x8x32xf32> -> vector<1x8x32xf32>
    "tpu.trace_stop"() : () -> ()
    %88 = vector.shape_cast %87 : vector<1x8x32xf32> to vector<8x32xf32>
    %89 = arith.truncf %88 : vector<8x32xf32> to vector<8x32xbf16>
    %c64 = arith.constant 64 : index
    %c0_38 = arith.constant 0 : index
    %90 = vector.load %arg9[%c64, %c0_38] : memref<128x128xbf16, #tpu.memory_space<vmem>>, vector<32x128xbf16>
    %cst_39 = arith.constant dense<0.000000e+00> : vector<8x128xf32>
    %91 = tpu.matmul %89, %90, %cst_39 {dimension_numbers = #tpu.dot_dimension_numbers<[1], [0], [0], [1], [0, 0, 1, 1], [], []>} : vector<8x32xbf16>, vector<32x128xbf16>, vector<8x128xf32> -> vector<8x128xf32>
    %92 = arith.addf %71, %91 : vector<8x128xf32>
    %93 = vector.extract_strided_slice %14 {offsets = [0, 0, 96], sizes = [1, 8, 32], strides = [1, 1, 1]} : vector<1x8x128xbf16> to vector<1x8x32xbf16>
    %94 = vector.extract_strided_slice %21 {offsets = [0, 0, 96], sizes = [1, 8, 32], strides = [1, 1, 1]} : vector<1x8x128xbf16> to vector<1x8x32xbf16>
    %95 = vector.extract_strided_slice %28 {offsets = [0, 0, 96], sizes = [1, 8, 32], strides = [1, 1, 1]} : vector<1x8x128xbf16> to vector<1x8x32xbf16>
    "tpu.trace_start"() <{level = 10 : i32, message = "bqd,bkd->bqk"}> : () -> ()
    %cst_40 = arith.constant dense<0.000000e+00> : vector<1x8x8xf32>
    %96 = tpu.matmul %93, %94, %cst_40 {dimension_numbers = #tpu.dot_dimension_numbers<[2], [2], [1], [1], [0, 0, 0, 1, 1, 1], [0], [0]>} : vector<1x8x32xbf16>, vector<1x8x32xbf16>, vector<1x8x8xf32> -> vector<1x8x8xf32>
    "tpu.trace_stop"() : () -> ()
    %cst_41 = arith.constant dense<0xFF800000> : vector<1x8xf32>
    %97 = vector.multi_reduction <maximumf>, %96, %cst_41 [2] : vector<1x8x8xf32> to vector<1x8xf32>
    %98 = vector.shape_cast %97 : vector<1x8xf32> to vector<1x8x1xf32>
    %99 = vector.broadcast %98 : vector<1x8x1xf32> to vector<1x8x8xf32>
    %100 = arith.subf %96, %99 : vector<1x8x8xf32>
    %101 = math.exp %100 : vector<1x8x8xf32>
    %cst_42 = arith.constant dense<0.000000e+00> : vector<1x8xf32>
    %102 = vector.multi_reduction <add>, %101, %cst_42 [2] : vector<1x8x8xf32> to vector<1x8xf32>
    %103 = vector.shape_cast %102 : vector<1x8xf32> to vector<1x8x1xf32>
    %104 = tpu.reciprocal %103 {approx = true} : vector<1x8x1xf32> -> vector<1x8x1xf32>
    %105 = vector.broadcast %104 : vector<1x8x1xf32> to vector<1x8x8xf32>
    %106 = arith.mulf %101, %105 : vector<1x8x8xf32>
    %107 = arith.truncf %106 : vector<1x8x8xf32> to vector<1x8x8xbf16>
    "tpu.trace_start"() <{level = 10 : i32, message = "bqk,bkd->bqd"}> : () -> ()
    %cst_43 = arith.constant dense<0.000000e+00> : vector<1x8x32xf32>
    %108 = tpu.matmul %107, %95, %cst_43 {dimension_numbers = #tpu.dot_dimension_numbers<[2], [1], [1], [2], [0, 0, 0, 1, 1, 2], [0], [0]>} : vector<1x8x8xbf16>, vector<1x8x32xbf16>, vector<1x8x32xf32> -> vector<1x8x32xf32>
    "tpu.trace_stop"() : () -> ()
    %109 = vector.shape_cast %108 : vector<1x8x32xf32> to vector<8x32xf32>
    %110 = arith.truncf %109 : vector<8x32xf32> to vector<8x32xbf16>
    %c96 = arith.constant 96 : index
    %c0_44 = arith.constant 0 : index
    %111 = vector.load %arg9[%c96, %c0_44] : memref<128x128xbf16, #tpu.memory_space<vmem>>, vector<32x128xbf16>
    %cst_45 = arith.constant dense<0.000000e+00> : vector<8x128xf32>
    %112 = tpu.matmul %110, %111, %cst_45 {dimension_numbers = #tpu.dot_dimension_numbers<[1], [0], [0], [1], [0, 0, 1, 1], [], []>} : vector<8x32xbf16>, vector<32x128xbf16>, vector<8x128xf32> -> vector<8x128xf32>
    %113 = arith.addf %92, %112 : vector<8x128xf32>
    %c0_46 = arith.constant 0 : index
    %c0_47 = arith.constant 0 : index
    %114 = vector.load %arg10[%c0_46, %c0_47] : memref<1x128xf32, #tpu.memory_space<vmem>>, vector<1x128xf32>
    %115 = vector.broadcast %114 : vector<1x128xf32> to vector<8x128xf32>
    %116 = arith.addf %113, %115 : vector<8x128xf32>
    %117 = arith.addf %1, %116 : vector<8x128xf32>
    %c0_48 = arith.constant 0 : index
    %c0_49 = arith.constant 0 : index
    %118 = vector.load %arg11[%c0_48, %c0_49] : memref<1x128xf32, #tpu.memory_space<vmem>>, vector<1x128xf32>
    %c0_50 = arith.constant 0 : index
    %c0_51 = arith.constant 0 : index
    %119 = vector.load %arg12[%c0_50, %c0_51] : memref<1x128xf32, #tpu.memory_space<vmem>>, vector<1x128xf32>
    %cst_52 = arith.constant dense<0.000000e+00> : vector<8xf32>
    %120 = vector.multi_reduction <add>, %117, %cst_52 [1] : vector<8x128xf32> to vector<8xf32>
    %121 = vector.shape_cast %120 : vector<8xf32> to vector<8x1xf32>
    %cst_53 = arith.constant 1.280000e+02 : f32
    %122 = vector.broadcast %cst_53 : f32 to vector<8x1xf32>
    %123 = arith.divf %121, %122 : vector<8x1xf32>
    %124 = vector.broadcast %123 : vector<8x1xf32> to vector<8x128xf32>
    %125 = arith.subf %117, %124 : vector<8x128xf32>
    %126 = arith.mulf %125, %125 : vector<8x128xf32>
    %cst_54 = arith.constant dense<0.000000e+00> : vector<8xf32>
    %127 = vector.multi_reduction <add>, %126, %cst_54 [1] : vector<8x128xf32> to vector<8xf32>
    %128 = vector.shape_cast %127 : vector<8xf32> to vector<8x1xf32>
    %cst_55 = arith.constant 1.280000e+02 : f32
    %129 = vector.broadcast %cst_55 : f32 to vector<8x1xf32>
    %130 = arith.divf %128, %129 : vector<8x1xf32>
    %131 = vector.broadcast %123 : vector<8x1xf32> to vector<8x128xf32>
    %132 = arith.subf %117, %131 : vector<8x128xf32>
    %cst_56 = arith.constant 9.99999974E-6 : f32
    %133 = vector.broadcast %cst_56 : f32 to vector<8x1xf32>
    %134 = arith.addf %130, %133 : vector<8x1xf32>
    %135 = math.rsqrt %134 : vector<8x1xf32>
    %136 = vector.broadcast %135 : vector<8x1xf32> to vector<8x128xf32>
    %137 = arith.mulf %132, %136 : vector<8x128xf32>
    %138 = vector.broadcast %118 : vector<1x128xf32> to vector<8x128xf32>
    %139 = arith.mulf %137, %138 : vector<8x128xf32>
    %140 = vector.broadcast %119 : vector<1x128xf32> to vector<8x128xf32>
    %141 = arith.addf %139, %140 : vector<8x128xf32>
    %142 = arith.truncf %141 : vector<8x128xf32> to vector<8x128xbf16>
    %c0_57 = arith.constant 0 : index
    %c0_58 = arith.constant 0 : index
    %143 = vector.load %arg13[%c0_57, %c0_58] : memref<128x128xbf16, #tpu.memory_space<vmem>>, vector<128x128xbf16>
    %cst_59 = arith.constant dense<0.000000e+00> : vector<8x128xf32>
    %144 = tpu.matmul %142, %143, %cst_59 {dimension_numbers = #tpu.dot_dimension_numbers<[1], [0], [0], [1], [0, 0, 1, 1], [], []>} : vector<8x128xbf16>, vector<128x128xbf16>, vector<8x128xf32> -> vector<8x128xf32>
    %c0_60 = arith.constant 0 : index
    %c0_61 = arith.constant 0 : index
    %145 = vector.load %arg14[%c0_60, %c0_61] : memref<1x128xf32, #tpu.memory_space<vmem>>, vector<1x128xf32>
    %146 = vector.broadcast %145 : vector<1x128xf32> to vector<8x128xf32>
    %147 = arith.addf %144, %146 : vector<8x128xf32>
    %148 = arith.negf %147 : vector<8x128xf32>
    %149 = math.exp %148 : vector<8x128xf32>
    %cst_62 = arith.constant 1.000000e+00 : f32
    %150 = vector.broadcast %cst_62 : f32 to vector<8x128xf32>
    %151 = arith.addf %150, %149 : vector<8x128xf32>
    %152 = arith.divf %150, %151 : vector<8x128xf32>
    %c0_63 = arith.constant 0 : index
    %c0_64 = arith.constant 0 : index
    %153 = vector.load %arg15[%c0_63, %c0_64] : memref<128x256xbf16, #tpu.memory_space<vmem>>, vector<128x256xbf16>
    %cst_65 = arith.constant dense<0.000000e+00> : vector<8x256xf32>
    %154 = tpu.matmul %5, %153, %cst_65 {dimension_numbers = #tpu.dot_dimension_numbers<[1], [0], [0], [1], [0, 0, 1, 1], [], []>} : vector<8x128xbf16>, vector<128x256xbf16>, vector<8x256xf32> -> vector<8x256xf32>
    %c0_66 = arith.constant 0 : index
    %c0_67 = arith.constant 0 : index
    %155 = vector.load %arg16[%c0_66, %c0_67] : memref<1x256xf32, #tpu.memory_space<vmem>>, vector<1x256xf32>
    %156 = vector.broadcast %155 : vector<1x256xf32> to vector<8x256xf32>
    %157 = arith.addf %154, %156 : vector<8x256xf32>
    %158 = arith.mulf %157, %157 : vector<8x256xf32>
    %159 = arith.mulf %157, %158 : vector<8x256xf32>
    %cst_68 = arith.constant 4.471500e-02 : f32
    %160 = vector.broadcast %cst_68 : f32 to vector<8x256xf32>
    %161 = arith.mulf %160, %159 : vector<8x256xf32>
    %162 = arith.addf %157, %161 : vector<8x256xf32>
    %cst_69 = arith.constant 0.797884583 : f32
    %163 = vector.broadcast %cst_69 : f32 to vector<8x256xf32>
    %164 = arith.mulf %163, %162 : vector<8x256xf32>
    %165 = math.tanh %164 : vector<8x256xf32>
    %cst_70 = arith.constant 1.000000e+00 : f32
    %166 = vector.broadcast %cst_70 : f32 to vector<8x256xf32>
    %167 = arith.addf %166, %165 : vector<8x256xf32>
    %cst_71 = arith.constant 5.000000e-01 : f32
    %168 = vector.broadcast %cst_71 : f32 to vector<8x256xf32>
    %169 = arith.mulf %168, %167 : vector<8x256xf32>
    %170 = arith.mulf %157, %169 : vector<8x256xf32>
    %171 = arith.truncf %170 : vector<8x256xf32> to vector<8x256xbf16>
    %c0_72 = arith.constant 0 : index
    %c0_73 = arith.constant 0 : index
    %172 = vector.load %arg17[%c0_72, %c0_73] : memref<256x128xbf16, #tpu.memory_space<vmem>>, vector<256x128xbf16>
    %cst_74 = arith.constant dense<0.000000e+00> : vector<8x128xf32>
    %173 = tpu.matmul %171, %172, %cst_74 {dimension_numbers = #tpu.dot_dimension_numbers<[1], [0], [0], [1], [0, 0, 1, 1], [], []>} : vector<8x256xbf16>, vector<256x128xbf16>, vector<8x128xf32> -> vector<8x128xf32>
    %c0_75 = arith.constant 0 : index
    %c0_76 = arith.constant 0 : index
    %174 = vector.load %arg18[%c0_75, %c0_76] : memref<1x128xf32, #tpu.memory_space<vmem>>, vector<1x128xf32>
    %175 = vector.broadcast %174 : vector<1x128xf32> to vector<8x128xf32>
    %176 = arith.addf %173, %175 : vector<8x128xf32>
    %177 = arith.mulf %152, %176 : vector<8x128xf32>
    %178 = arith.addf %3, %177 : vector<8x128xf32>
    %c0_77 = arith.constant 0 : index
    %c0_78 = arith.constant 0 : index
    %179 = vector.load %arg19[%c0_77, %c0_78] : memref<1x128xf32, #tpu.memory_space<vmem>>, vector<1x128xf32>
    %c0_79 = arith.constant 0 : index
    %c0_80 = arith.constant 0 : index
    %180 = vector.load %arg20[%c0_79, %c0_80] : memref<1x128xf32, #tpu.memory_space<vmem>>, vector<1x128xf32>
    %cst_81 = arith.constant dense<0.000000e+00> : vector<8xf32>
    %181 = vector.multi_reduction <add>, %178, %cst_81 [1] : vector<8x128xf32> to vector<8xf32>
    %182 = vector.shape_cast %181 : vector<8xf32> to vector<8x1xf32>
    %cst_82 = arith.constant 1.280000e+02 : f32
    %183 = vector.broadcast %cst_82 : f32 to vector<8x1xf32>
    %184 = arith.divf %182, %183 : vector<8x1xf32>
    %185 = vector.broadcast %184 : vector<8x1xf32> to vector<8x128xf32>
    %186 = arith.subf %178, %185 : vector<8x128xf32>
    %187 = arith.mulf %186, %186 : vector<8x128xf32>
    %cst_83 = arith.constant dense<0.000000e+00> : vector<8xf32>
    %188 = vector.multi_reduction <add>, %187, %cst_83 [1] : vector<8x128xf32> to vector<8xf32>
    %189 = vector.shape_cast %188 : vector<8xf32> to vector<8x1xf32>
    %cst_84 = arith.constant 1.280000e+02 : f32
    %190 = vector.broadcast %cst_84 : f32 to vector<8x1xf32>
    %191 = arith.divf %189, %190 : vector<8x1xf32>
    %192 = vector.broadcast %184 : vector<8x1xf32> to vector<8x128xf32>
    %193 = arith.subf %178, %192 : vector<8x128xf32>
    %cst_85 = arith.constant 9.99999974E-6 : f32
    %194 = vector.broadcast %cst_85 : f32 to vector<8x1xf32>
    %195 = arith.addf %191, %194 : vector<8x1xf32>
    %196 = math.rsqrt %195 : vector<8x1xf32>
    %197 = vector.broadcast %196 : vector<8x1xf32> to vector<8x128xf32>
    %198 = arith.mulf %193, %197 : vector<8x128xf32>
    %199 = vector.broadcast %179 : vector<1x128xf32> to vector<8x128xf32>
    %200 = arith.mulf %198, %199 : vector<8x128xf32>
    %201 = vector.broadcast %180 : vector<1x128xf32> to vector<8x128xf32>
    %202 = arith.addf %200, %201 : vector<8x128xf32>
    %203 = vector.shape_cast %141 : vector<8x128xf32> to vector<1x8x128xf32>
    %c0_86 = arith.constant 0 : index
    %c0_87 = arith.constant 0 : index
    %c0_88 = arith.constant 0 : index
    %204 = vector.load %arg21[%c0_86, %c0_87, %c0_88] : memref<1x8x128xf32, #tpu.memory_space<vmem>>, vector<1x8x128xf32>
    tpu.vector_store %arg21[%c0_86, %c0_87, %c0_88], %203 {strides = array<i32>} : memref<1x8x128xf32, #tpu.memory_space<vmem>>, vector<1x8x128xf32>,
    %205 = vector.shape_cast %202 : vector<8x128xf32> to vector<1x8x128xf32>
    %c0_89 = arith.constant 0 : index
    %c0_90 = arith.constant 0 : index
    %c0_91 = arith.constant 0 : index
    %206 = vector.load %arg22[%c0_89, %c0_90, %c0_91] : memref<1x8x128xf32, #tpu.memory_space<vmem>>, vector<1x8x128xf32>
    tpu.vector_store %arg22[%c0_89, %c0_90, %c0_91], %205 {strides = array<i32>} : memref<1x8x128xf32, #tpu.memory_space<vmem>>, vector<1x8x128xf32>,
    return
  }
  func.func @transform_0(%arg0: i32) -> (i32, i32, i32) {
    %c0_i32 = arith.constant 0 : i32
    %c0_i32_0 = arith.constant 0 : i32
    %c0_i32_1 = arith.constant 0 : i32
    return %arg0, %c0_i32, %c0_i32_0 : i32, i32, i32
  }
  func.func @transform_1(%arg0: i32) -> (i32, i32, i32) {
    %c0_i32 = arith.constant 0 : i32
    %c0_i32_0 = arith.constant 0 : i32
    %c0_i32_1 = arith.constant 0 : i32
    return %arg0, %c0_i32, %c0_i32_0 : i32, i32, i32
  }
  func.func @transform_2(%arg0: i32) -> (i32, i32) {
    %c0_i32 = arith.constant 0 : i32
    %c0_i32_0 = arith.constant 0 : i32
    %c0_i32_1 = arith.constant 0 : i32
    return %c0_i32, %c0_i32_0 : i32, i32
  }
  func.func @transform_3(%arg0: i32) -> (i32, i32) {
    %c0_i32 = arith.constant 0 : i32
    %c0_i32_0 = arith.constant 0 : i32
    %c0_i32_1 = arith.constant 0 : i32
    return %c0_i32, %c0_i32_0 : i32, i32
  }
  func.func @transform_4(%arg0: i32) -> (i32, i32) {
    %c0_i32 = arith.constant 0 : i32
    %c0_i32_0 = arith.constant 0 : i32
    %c0_i32_1 = arith.constant 0 : i32
    return %c0_i32, %c0_i32_0 : i32, i32
  }
  func.func @transform_5(%arg0: i32) -> (i32, i32) {
    %c0_i32 = arith.constant 0 : i32
    %c0_i32_0 = arith.constant 0 : i32
    %c0_i32_1 = arith.constant 0 : i32
    return %c0_i32, %c0_i32_0 : i32, i32
  }
  func.func @transform_6(%arg0: i32) -> (i32, i32) {
    %c0_i32 = arith.constant 0 : i32
    %c0_i32_0 = arith.constant 0 : i32
    %c0_i32_1 = arith.constant 0 : i32
    return %c0_i32, %c0_i32_0 : i32, i32
  }
  func.func @transform_7(%arg0: i32) -> (i32, i32) {
    %c0_i32 = arith.constant 0 : i32
    %c0_i32_0 = arith.constant 0 : i32
    %c0_i32_1 = arith.constant 0 : i32
    return %c0_i32, %c0_i32_0 : i32, i32
  }
  func.func @transform_8(%arg0: i32) -> (i32, i32) {
    %c0_i32 = arith.constant 0 : i32
    %c0_i32_0 = arith.constant 0 : i32
    %c0_i32_1 = arith.constant 0 : i32
    return %c0_i32, %c0_i32_0 : i32, i32
  }
  func.func @transform_9(%arg0: i32) -> (i32, i32) {
    %c0_i32 = arith.constant 0 : i32
    %c0_i32_0 = arith.constant 0 : i32
    %c0_i32_1 = arith.constant 0 : i32
    return %c0_i32, %c0_i32_0 : i32, i32
  }
  func.func @transform_10(%arg0: i32) -> (i32, i32) {
    %c0_i32 = arith.constant 0 : i32
    %c0_i32_0 = arith.constant 0 : i32
    %c0_i32_1 = arith.constant 0 : i32
    return %c0_i32, %c0_i32_0 : i32, i32
  }
  func.func @transform_11(%arg0: i32) -> (i32, i32) {
    %c0_i32 = arith.constant 0 : i32
    %c0_i32_0 = arith.constant 0 : i32
    %c0_i32_1 = arith.constant 0 : i32
    return %c0_i32, %c0_i32_0 : i32, i32
  }
  func.func @transform_12(%arg0: i32) -> (i32, i32) {
    %c0_i32 = arith.constant 0 : i32
    %c0_i32_0 = arith.constant 0 : i32
    %c0_i32_1 = arith.constant 0 : i32
    return %c0_i32, %c0_i32_0 : i32, i32
  }
  func.func @transform_13(%arg0: i32) -> (i32, i32) {
    %c0_i32 = arith.constant 0 : i32
    %c0_i32_0 = arith.constant 0 : i32
    %c0_i32_1 = arith.constant 0 : i32
    return %c0_i32, %c0_i32_0 : i32, i32
  }
  func.func @transform_14(%arg0: i32) -> (i32, i32) {
    %c0_i32 = arith.constant 0 : i32
    %c0_i32_0 = arith.constant 0 : i32
    %c0_i32_1 = arith.constant 0 : i32
    return %c0_i32, %c0_i32_0 : i32, i32
  }
  func.func @transform_15(%arg0: i32) -> (i32, i32) {
    %c0_i32 = arith.constant 0 : i32
    %c0_i32_0 = arith.constant 0 : i32
    %c0_i32_1 = arith.constant 0 : i32
    return %c0_i32, %c0_i32_0 : i32, i32
  }
  func.func @transform_16(%arg0: i32) -> (i32, i32) {
    %c0_i32 = arith.constant 0 : i32
    %c0_i32_0 = arith.constant 0 : i32
    %c0_i32_1 = arith.constant 0 : i32
    return %c0_i32, %c0_i32_0 : i32, i32
  }
  func.func @transform_17(%arg0: i32) -> (i32, i32) {
    %c0_i32 = arith.constant 0 : i32
    %c0_i32_0 = arith.constant 0 : i32
    %c0_i32_1 = arith.constant 0 : i32
    return %c0_i32, %c0_i32_0 : i32, i32
  }
  func.func @transform_18(%arg0: i32) -> (i32, i32) {
    %c0_i32 = arith.constant 0 : i32
    %c0_i32_0 = arith.constant 0 : i32
    %c0_i32_1 = arith.constant 0 : i32
    return %c0_i32, %c0_i32_0 : i32, i32
  }
  func.func @transform_19(%arg0: i32) -> (i32, i32) {
    %c0_i32 = arith.constant 0 : i32
    %c0_i32_0 = arith.constant 0 : i32
    %c0_i32_1 = arith.constant 0 : i32
    return %c0_i32, %c0_i32_0 : i32, i32
  }
  func.func @transform_20(%arg0: i32) -> (i32, i32, i32) {
    %c0_i32 = arith.constant 0 : i32
    %c0_i32_0 = arith.constant 0 : i32
    %c0_i32_1 = arith.constant 0 : i32
    return %arg0, %c0_i32, %c0_i32_0 : i32, i32, i32
  }
  func.func @transform_21(%arg0: i32) -> (i32, i32, i32) {
    %c0_i32 = arith.constant 0 : i32
    %c0_i32_0 = arith.constant 0 : i32
    %c0_i32_1 = arith.constant 0 : i32
    return %arg0, %c0_i32, %c0_i32_0 : i32, i32, i32
  }
}

</mosaic_0001>

<bundles_post_ra>
// kernel: tpu_custom_call.1
= control target key start
LH: loop header
LB: loop body
LE: loop exit
PB: predicated region body
PF: predicated region fallthrough
CT: control target
= control target key end

     0   :  { %s4199_s0 = inlined_call_operand.hbm [shape: f32[2,8,128], index: 0, kind: input, shape index: {}]   ;;  %s4200_s1 = inlined_call_operand.hbm [shape: f32[2,8,128], index: 1, kind: input, shape index: {}]   ;;  %s4201_s2 = inlined_call_operand.hbm [shape: bf16[128,128], index: 2, kind: input, shape index: {}]   ;;  %s4202_s3 = inlined_call_operand.vmem [shape: f32[1,128], index: 3, kind: input, shape index: {}]   ;;  %s4203_s4 = inlined_call_operand.hbm [shape: bf16[128,128], index: 4, kind: input, shape index: {}]   ;;  %s4204_s5 = inlined_call_operand.vmem [shape: f32[1,128], index: 5, kind: input, shape index: {}]   ;;  %s4205_s6 = inlined_call_operand.hbm [shape: bf16[128,128], index: 6, kind: input, shape index: {}]   ;;  %s4206_s7 = inlined_call_operand.vmem [shape: f32[1,128], index: 7, kind: input, shape index: {}]   ;;  %s4207_s8 = inlined_call_operand.hbm [shape: bf16[128,128], index: 8, kind: input, shape index: {}]   ;;  %s4208_s9 = inlined_call_operand.vmem [shape: f32[1,128], index: 9, kind: input, shape index: {}]   ;;  %s4209_s10 = inlined_call_operand.vmem [shape: f32[1,128], index: 10, kind: input, shape index: {}]   ;;  %s4210_s11 = inlined_call_operand.vmem [shape: f32[1,128], index: 11, kind: input, shape index: {}]   ;;  %s4211_s12 = inlined_call_operand.hbm [shape: bf16[128,128], index: 12, kind: input, shape index: {}]   ;;  %s4212_s13 = inlined_call_operand.vmem [shape: f32[1,128], index: 13, kind: input, shape index: {}]   ;;  %s4213_s14 = inlined_call_operand.hbm [shape: bf16[128,256], index: 14, kind: input, shape index: {}]   ;;  %s4214_s15 = inlined_call_operand.vmem [shape: f32[1,256], index: 15, kind: input, shape index: {}]   ;;  %s4215_s16 = inlined_call_operand.hbm [shape: bf16[256,128], index: 16, kind: input, shape index: {}]   ;;  %s4216_s17 = inlined_call_operand.vmem [shape: f32[1,128], index: 17, kind: input, shape index: {}]   ;;  %s4217_s18 = inlined_call_operand.vmem [shape: f32[1,128], index: 18, kind: input, shape index: {}]   ;;  %s4218_s19 = inlined_call_operand.vmem [shape: f32[1,128], index: 19, kind: input, shape index: {}]   ;;  %s4219_s20 = inlined_call_operand.hbm [shape: f32[2,8,128], index: 20, kind: output, shape index: {0}]   ;;  %s4220_s21 = inlined_call_operand.hbm [shape: f32[2,8,128], index: 21, kind: output, shape index: {1}]  }
   0x1   :  { %4238 = sst [smem:[#allocation33_spill]] %s4199_s0 }
   0x2   :  { %4239 = sst [smem:[#allocation34_spill]] %s4200_s1 }
   0x3   :  { %4240 = sst [smem:[#allocation35_spill]] %s4201_s2 }
   0x4   :  { %4241 = sst [smem:[#allocation36_spill]] %s4202_s3 }
   0x5   :  { %4242 = sst [smem:[#allocation37_spill]] %s4203_s4 }
   0x6   :  { %4243 = sst [smem:[#allocation38_spill]] %s4204_s5 }
   0x7   :  { %4244 = sst [smem:[#allocation39_spill]] %s4205_s6 }
   0x8   :  { %4245 = sst [smem:[#allocation40_spill]] %s4207_s8 }
   0x9   :  { %4246 = sst [smem:[#allocation41_spill]] %s4211_s12 }
   0xa   :  { %4247 = sst [smem:[#allocation42_spill]] %s4213_s14 }
   0xb   :  { %4248 = sst [smem:[#allocation43_spill]] %s4215_s16 }
   0xc   :  { %4249 = sst [smem:[#allocation44_spill]] %s4217_s18 }
   0xd   :  { %4250 = sst [smem:[#allocation45_spill]] %s4218_s19 }
   0xe   :  { %4251 = sst [smem:[#allocation46_spill]] %s4219_s20 }
   0xf   :  { %4252 = sst [smem:[#allocation47_spill]] %s4220_s21 }
  0x10   :  { %27 = vsyncpa [#allocation3], 0 }
  0x11   :  { %29 = vsyncpa [#allocation3 + $0x1], 0 }
  0x12   :  { %30 = vsyncpa [#allocation6], 0 }
  0x13   :  { %32 = vsyncpa [#allocation6 + $0x1], 0 }
  0x14   :  { %33 = vsyncpa [#allocation9], 0 }
  0x15   :  { %34 = vsyncpa [#allocation12], 0 }
  0x16   :  { %35 = vsyncpa [#allocation15], 0 }
  0x17   :  { %36 = vsyncpa [#allocation4], 0 }
  0x18   :  { %38 = vsyncpa [#allocation4 + $0x1], 0 }
  0x19   :  { %39 = vsyncpa [#allocation19], 0 }
  0x1a   :  { %41 = vsyncpa [#allocation19 + $0x1], 0  ;;  %s3702_s2 = smov 0   ;;  %s3704_s25 = smov 0  }
  0x1b   :  { %s3706_s26 = smov 0   ;;  %s3708_s27 = smov 0  }
  0x1c LB: > { %4253 = sst [smem:[#allocation28_spill]] %s3557_s2  ;;  %s3571_s3 = smov [#allocation7]   ;;  %s3569_s27 = sphi %s3708_s27, %s4297_s27   ;;  %s3565_s26 = sphi %s3706_s26, %s4299_s26   ;;  %s3561_s25 = sphi %s3704_s25, %s4301_s25   ;;  %s3557_s2 = sphi %s3702_s2, %s4300_s2  }
  0x1d   : > { %4254 = sst [smem:[#allocation29_spill]] %s3565_s26  ;;  %s546_s28 = sshll.u32 %s3571_s3, 4  ;;  %s547_s28 = int_to_ptr.vmem [resolvable:$true] %s546_s28 }
  0x1e   : > { %s3723_s29 = sadd.s32 4294967295, %s3569_s27   ;;  %p2599_p0 = scmp.ge.s32.totalorder %s3569_s27, 1 }
  0x1f   : > { %p4234_p1 = scmp.eq.s32.totalorder %s3723_s29, 0  ;;  %p534_p2 = scmp.lt.s32.totalorder %s3569_s27, 3 }
  0x20   : > { %s3572_s4 = smov [#allocation8]   ;;  %s3573_s22 = smov [#allocation11]  }
  0x21   : > { %p3728_p3 = pnand %p2599_p0, %p534_p2  ;;  %s562_s30 = sshll.u32 %s3572_s4, 4  ;;  %s3741_s30 = int_to_ptr.vmem [resolvable:$true] %s562_s30 }
  0x22   : > { %s594_s23 = sshll.u32 %s3573_s22, 4  ;;  %s3228_s24 = scalar_lea.vmem %s547_s28, 1024  ;;  %s3743_s23 = int_to_ptr.vmem [resolvable:$true] %s594_s23 }
  0x23   : > { %s4255_s0 = scalar_select %p3728_p3, 1, 0 }
  0x24   : > { %p3007_p5 = pneg %p3728_p3  ;;  %p3229_p8 = scmp.ne.s32.totalorder %s547_s28, %s3228_s24 }
  0x25   : > { %p3236_p11 = scmp.lt.s32.totalorder %s547_s28, %s547_s28  ;;  %p3237_p12 = scmp.lt.s32.totalorder %s3228_s24, %s3228_s24 }
  0x26   : > { %p3737_p6 = pnand %p3007_p5, %p4234_p1 }
  0x27   : > { %p3238_p13 = por %p3237_p12, %p3236_p11 }
  0x28   : > { %p3747_p7 = pneg %p3737_p6 }
  0x2a   : > { %p3231_p9 = pnand %p3229_p8, %p3747_p7 }
  0x2c   : > { %p3232_p10 = pneg %p3231_p9 }
  0x2e   : > { %p3239_p0 = pnand %p3238_p13, %p3232_p10 }
  0x30   : > { %3242 = shalt.err (!%p3239_p0)
}
  0x31   : > { %s4224_s3 = smov 64   ;;  %s4226_s4 = smov 4  }
  0x32   : > { %s4258_s19 = sld [smem:[#allocation35_spill]]  ;;  %s3254_s18 = scalar_lea.vmem %s3741_s30, 1024 }
  0x33   : > { %p3255_p2 = scmp.ne.s32.totalorder %s3741_s30, %s3254_s18  ;;  %p3262_p9 = scmp.lt.s32.totalorder %s3741_s30, %s3741_s30 }
  0x34   : > { %p3263_p10 = scmp.lt.s32.totalorder %s3254_s18, %s3254_s18 }
  0x35   : > { %p3257_p5 = pnand %p3255_p2, %p3747_p7 }
  0x36   : > { %p3264_p11 = por %p3263_p10, %p3262_p9 }
  0x37   : > { %p3258_p8 = pneg %p3257_p5 }
  0x38   : > { %3010 = dma.hbm_to_vmem [thread:$0]  (!%p3737_p6), %s4258_s19, 1024, %s547_s28, [#allocation6], %s4224_s3, %s4224_s3, %s4226_s4  }
  0x39   : > { %p3265_p12 = pnand %p3264_p11, %p3258_p8 }
  0x3b   : > { %3268 = shalt.err (!%p3265_p12)
}
  0x3c   : > { %s4259_s19 = sld [smem:[#allocation37_spill]]  ;;  %s3280_s28 = scalar_lea.vmem %s3743_s23, 1024 }
  0x3d   : > { %p3281_p13 = scmp.ne.s32.totalorder %s3743_s23, %s3280_s28  ;;  %p3288_p5 = scmp.lt.s32.totalorder %s3743_s23, %s3743_s23 }
  0x3e   : > { %p3289_p8 = scmp.lt.s32.totalorder %s3280_s28, %s3280_s28 }
  0x3f   : > { %p3283_p0 = pnand %p3281_p13, %p3747_p7 }
  0x40   : > { %p3290_p9 = por %p3289_p8, %p3288_p5 }
  0x41   : > { %p3284_p2 = pneg %p3283_p0 }
  0x42   : > { %3013 = dma.hbm_to_vmem [thread:$0]  (!%p3737_p6), %s4259_s19, 1024, %s3741_s30, [#allocation9], %s4224_s3, %s4224_s3, %s4226_s4  }
  0x43   : > { %p3291_p10 = pnand %p3290_p9, %p3284_p2 }
  0x45   : > { %3294 = shalt.err (!%p3291_p10)
}
  0x46   : > { %s4260_s8 = sld [smem:[#allocation40_spill]]  ;;  %s3576_s30 = smov [#allocation14]  }
  0x47   : > { %s632_s24 = sshll.u32 %s3576_s30, 4  ;;  %s633_s24 = int_to_ptr.vmem [resolvable:$true] %s632_s24 }
  0x48   : > { %s3306_s21 = scalar_lea.vmem %s633_s24, 2048  ;;  %p3314_p0 = scmp.lt.s32.totalorder %s633_s24, %s633_s24 }
  0x49   : > { %p3307_p11 = scmp.ne.s32.totalorder %s633_s24, %s3306_s21  ;;  %p3315_p2 = scmp.lt.s32.totalorder %s3306_s21, %s3306_s21 }
  0x4b   : > { %p3309_p12 = pnand %p3307_p11, %p3747_p7  ;;  %p3316_p5 = por %p3315_p2, %p3314_p0 }
  0x4c   : > { %3019 = dma.hbm_to_vmem [thread:$0]  (!%p3737_p6), %s4260_s8, 1024, %s3743_s23, [#allocation12], %s4224_s3, %s4224_s3, %s4226_s4  }
  0x4d   : > { %p3310_p13 = pneg %p3309_p12 }
  0x4f   : > { %p3317_p8 = pnand %p3316_p5, %p3310_p13 }
  0x51   : > { %3320 = shalt.err (!%p3317_p8)
}
  0x52   : > { %s3577_s19 = smov 128   ;;  %s3578_s28 = smov 8  }
  0x53   : > { %s4261_s14 = sld [smem:[#allocation42_spill]]  ;;  %s3579_s22 = smov [#allocation10]  }
  0x54   : > { %s578_s30 = sshll.u32 %s3579_s22, 4  ;;  %s3580_s3 = smov [#allocation13]   ;;  %s579_s30 = int_to_ptr.vmem [resolvable:$true] %s578_s30 }
  0x55   : > { %s616_s4 = sshll.u32 %s3580_s3, 4  ;;  %s3332_s8 = scalar_lea.vmem %s579_s30, 1024  ;;  %s617_s4 = int_to_ptr.vmem [resolvable:$true] %s616_s4 }
  0x56   : > { %p3333_p9 = scmp.ne.s32.totalorder %s579_s30, %s3332_s8  ;;  %p3340_p12 = scmp.lt.s32.totalorder %s579_s30, %s579_s30 }
  0x57   : > { %p3341_p13 = scmp.lt.s32.totalorder %s3332_s8, %s3332_s8 }
  0x58   : > { %p3335_p10 = pnand %p3333_p9, %p3747_p7 }
  0x59   : > { %3025 = dma.hbm_to_vmem [thread:$0]  (!%p3737_p6), %s4261_s14, 2048, %s633_s24, [#allocation15], %s3577_s19, %s3577_s19, %s3578_s28  }
  0x5a   : > { %p3336_p11 = pneg %p3335_p10  ;;  %p3342_p0 = por %p3341_p13, %p3340_p12 }
  0x5c   : > { %p3343_p2 = pnand %p3342_p0, %p3336_p11 }
  0x5e   : > { %3346 = shalt.err (!%p3343_p2)
}
  0x5f   : > { %s4262_s21 = smov 4   ;;  %s4263_s24 = smov 64  }
  0x60   : > { %s4264_s6 = sld [smem:[#allocation39_spill]]  ;;  %s3358_s3 = scalar_lea.vmem %s617_s4, 1024 }
  0x61   : > { %p3359_p5 = scmp.ne.s32.totalorder %s617_s4, %s3358_s3  ;;  %p3366_p10 = scmp.lt.s32.totalorder %s617_s4, %s617_s4 }
  0x62   : > { %p3367_p4 = scmp.lt.s32.totalorder %s3358_s3, %s3358_s3 }
  0x63   : > { %p3361_p8 = pnand %p3359_p5, %p3747_p7 }
  0x64   : > { %p3368_p12 = por %p3367_p4, %p3366_p10 }
  0x65   : > { %p3362_p9 = pneg %p3361_p8 }
  0x66   : > { %3016 = dma.hbm_to_vmem [thread:$0]  (!%p3737_p6), %s4264_s6, 1024, %s579_s30, [#allocation9], %s4263_s24, %s4263_s24, %s4262_s21  }
  0x67   : > { %p3369_p11 = pnand %p3368_p12, %p3362_p9 }
  0x69   : > { %3372 = shalt.err (!%p3369_p11)
}
  0x6a   : > { %s4265_s12 = sld [smem:[#allocation41_spill]]  ;;  %s3581_s23 = smov [#allocation16]  }
  0x6b   : > { %s648_s22 = sshll.u32 %s3581_s23, 4  ;;  %s649_s22 = int_to_ptr.vmem [resolvable:$true] %s648_s22 }
  0x6c   : > { %s3384_s30 = scalar_lea.vmem %s649_s22, 2048  ;;  %p3392_p2 = scmp.lt.s32.totalorder %s649_s22, %s649_s22 }
  0x6d   : > { %p3385_p13 = scmp.ne.s32.totalorder %s649_s22, %s3384_s30  ;;  %p3393_p5 = scmp.lt.s32.totalorder %s3384_s30, %s3384_s30 }
  0x6f   : > { %p3387_p0 = pnand %p3385_p13, %p3747_p7  ;;  %p3394_p8 = por %p3393_p5, %p3392_p2 }
  0x70   : > { %3022 = dma.hbm_to_vmem [thread:$0]  (!%p3737_p6), %s4265_s12, 1024, %s617_s4, [#allocation12], %s4263_s24, %s4263_s24, %s4262_s21  }
  0x71   : > { %p3388_p4 = pneg %p3387_p0 }
  0x73   : > { %p3395_p9 = pnand %p3394_p8, %p3388_p4 }
  0x75   : > { %3398 = shalt.err (!%p3395_p9)
}
  0x76   : > { %s4266_s16 = sld [smem:[#allocation43_spill]]  ;;  %s2598_s5 = sadd.s32 4294967294, %s3569_s27  }
  0x77   : > { %s3830_s1 = sadd.s32 1, %s3569_s27   ;;  %s54_s28 = sadd.s32 1, %s3565_s26 }
  0x78   : > { %4267 = sst [smem:[#allocation30_spill]] %s3830_s1  ;;  %s51_s3 = ssub.s32 %s3569_s27, %s3830_s1 }
  0x79   : > { %p61_p7 = scmp.ne.s32.totalorder %s3565_s26, %s3561_s25  ;;  %p52_p10 = scmp.eq.s32.totalorder %s51_s3, 0 }
  0x7a   : > { %p62_p12 = scmp.eq.s32.totalorder %s3569_s27, 0  ;;  %p67_p11 = scmp.ne.s32.totalorder %s3561_s25, %s3557_s2 }
  0x7b   : > { %p495_p13 = scmp.eq.s32.totalorder %s3723_s29, 1  ;;  %p501_p2 = scmp.eq.s32.totalorder %s2598_s5, 1 }
  0x7c   : > { %3028 = dma.hbm_to_vmem [thread:$0]  (!%p3737_p6), %s4266_s16, 2048, %s649_s22, [#allocation15], %s4263_s24, %s4263_s24, %s4262_s21  }
  0x7d   : > { %s3842_s8 = scalar_select %p52_p10, %s3565_s26, %s54_s28  }
  0x7e   : > { %p63_p0 = por %p62_p12, %p61_p7  ;;  %p3846_p4 = por %p4234_p1, %p67_p11 }
  0x7f   : > { %4268 = sst [smem:[#allocation31_spill]] %s3842_s8  ;;  %p3850_p6 = por %p495_p13, %p61_p7 }
  0x80   : > { %s4269_s18 = scalar_select %p3846_p4, 1, 0 }
  0x81   : > { %s4270_s21 = scalar_select %p3850_p6, 1, 0 }
  0x82   : > { %p3050_p5 = scmp.lt.s32.totalorder %s3569_s27, 2  ;;  %s671_s24 = sand.u32 1, %s3565_s26  }
  0x83   : > { %p3856_p8 = por %p501_p2, %p67_p11  ;;  %s3860_s22 = sshll.u32 %s671_s24, 3 }
  0x84   : > { %s2609_s30 = sshll.u32 %s3569_s27, 7  ;;  %s4273_s28 = sld [smem:[#allocation33_spill]] }
  0x85   : > { %s4271_s23 = scalar_select %p3856_p8, 1, 0 }
  0x86   : > { %s675_s6 = scalar_lea.vmem [#allocation2], %s3860_s22  ;;  %p3869_p9 = pnand %p3050_p5, %p63_p0 }
  0x87   : > { %4272 = sst [smem:[#allocation32_spill]] %s4271_s23  ;;  %s682_s5 = sshll.u32 %s675_s6, 4  ;;  %s683_s5 = int_to_ptr.vmem [resolvable:$true] %s682_s5 }
  0x88   : > { %s4275_s8 = sld [smem:[#allocation34_spill]]  ;;  %s672_s19 = scalar_lea.sflag [#allocation3], %s671_s24 }
  0x89   : > { %p3401_p10 = pneg %p3869_p9 }
  0x8a   : > { %s3866_s3 = scalar_lea.hbm %s4273_s28, %s2609_s30  ;;  %s3404_s23 = scalar_lea.hbm %s4273_s28, 256 }
  0x8b   : > { %s3399_s4 = scalar_lea.hbm %s3866_s3, 128  ;;  %p3405_p13 = scmp.lt.s32.totalorder %s3866_s3, %s4273_s28 }
  0x8c   : > { %p3400_p7 = scmp.ne.s32.totalorder %s3866_s3, %s3399_s4  ;;  %p3406_p0 = scmp.lt.s32.totalorder %s3404_s23, %s3399_s4 }
  0x8e   : > { %s3876_s26 = scalar_lea.hbm %s4275_s8, %s2609_s30  ;;  %p3402_p12 = pnand %p3401_p10, %p3400_p7 }
  0x8f   : > { %p3407_p2 = por %p3406_p0, %p3405_p13 }
  0x90   : > { %p3403_p11 = pneg %p3402_p12 }
  0x92   : > { %p3408_p5 = pnand %p3407_p2, %p3403_p11 }
  0x94   : > { %3411 = shalt.err (!%p3408_p5)
}
  0x95   : > { %s3412_s14 = scalar_lea.vmem %s683_s5, 128  ;;  %s3582_s16 = smov [#allocation2]  }
  0x96   : > { %p3413_p1 = scmp.ne.s32.totalorder %s683_s5, %s3412_s14  ;;  %s3417_s24 = sshll.u32 %s3582_s16, 4  ;;  %s3418_s24 = int_to_ptr.vmem [resolvable:$false] %s3417_s24 }
  0x97   : > { %s3419_s1 = scalar_lea.vmem %s3418_s24, 256  ;;  %p3420_p12 = scmp.lt.s32.totalorder %s683_s5, %s3418_s24 }
  0x98   : > { %p3415_p8 = pnand %p3413_p1, %p3401_p10  ;;  %p3421_p6 = scmp.lt.s32.totalorder %s3419_s1, %s3412_s14 }
  0x9a   : > { %p3416_p7 = pneg %p3415_p8  ;;  %p3422_p4 = por %p3421_p6, %p3420_p12 }
  0x9c   : > { %p3423_p3 = pnand %p3422_p4, %p3416_p7 }
  0x9e   : > { %3426 = shalt.err (!%p3423_p3)
}
  0x9f   : > { %3032 = dma.hbm_to_vmem [thread:$0]  (!%p3869_p9), %s3866_s3, 128, %s683_s5, %s672_s19  }
  0xa0   : > { %s689_s20 = sand.u32 1, %s3569_s27   ;;  %s693_s2 = scalar_lea.vmem [#allocation5], %s3860_s22 }
  0xa1   : > { %s700_s23 = sshll.u32 %s693_s2, 4  ;;  %s690_s30 = scalar_lea.sflag [#allocation6], %s689_s20  ;;  %s701_s23 = int_to_ptr.vmem [resolvable:$true] %s700_s23 }
  0xa2   : > { %s3427_s4 = scalar_lea.hbm %s3876_s26, 128  ;;  %s3432_s16 = scalar_lea.hbm %s4275_s8, 256 }
  0xa3   : > { %p3428_p1 = scmp.ne.s32.totalorder %s3876_s26, %s3427_s4  ;;  %p3433_p6 = scmp.lt.s32.totalorder %s3876_s26, %s4275_s8 }
  0xa4   : > { %p3434_p8 = scmp.lt.s32.totalorder %s3432_s16, %s3427_s4 }
  0xa5   : > { %p3430_p3 = pnand %p3428_p1, %p3401_p10 }
  0xa6   : > { %p3435_p11 = por %p3434_p8, %p3433_p6 }
  0xa7   : > { %p3431_p4 = pneg %p3430_p3 }
  0xa9   : > { %p3436_p13 = pnand %p3435_p11, %p3431_p4 }
  0xab   : > { %3439 = shalt.err (!%p3436_p13)
}
  0xac   : > { %s3440_s22 = scalar_lea.vmem %s701_s23, 128  ;;  %s3583_s3 = smov [#allocation5]  }
  0xad   : > { %p3441_p0 = scmp.ne.s32.totalorder %s701_s23, %s3440_s22  ;;  %s3445_s5 = sshll.u32 %s3583_s3, 4  ;;  %s3446_s5 = int_to_ptr.vmem [resolvable:$false] %s3445_s5 }
  0xae   : > { %s3447_s19 = scalar_lea.vmem %s3446_s5, 256  ;;  %p3448_p7 = scmp.lt.s32.totalorder %s701_s23, %s3446_s5 }
  0xaf   : > { %p3443_p2 = pnand %p3441_p0, %p3401_p10  ;;  %p3449_p12 = scmp.lt.s32.totalorder %s3447_s19, %s3440_s22 }
  0xb1   : > { %p3444_p5 = pneg %p3443_p2  ;;  %p3450_p1 = por %p3449_p12, %p3448_p7 }
  0xb3   : > { %p3451_p3 = pnand %p3450_p1, %p3444_p5 }
  0xb5   : > { %3454 = shalt.err (!%p3451_p3)
}
  0xb6   : > { %3035 = dma.hbm_to_vmem [thread:$0]  (!%p3869_p9), %s3876_s26, 128, %s701_s23, %s690_s30  }
  0xb7   : > { %p4276_p4 = scmp.ne.s32.totalorder %s4255_s0, 0 }
  0xb8   : > { %s3921_s20 = sand.u32 (!%p4276_p4), 1, %s3561_s25   ;;  %p4277_p10 = scmp.ne.s32.totalorder (!%p4276_p4), %s4269_s18, 0 }
  0xb9   : > { %709 = sbr.rel (%p4276_p4) target bundleno = 3957 (0xf75), region = 100  ;;  %s3924_s2 = sshll.u32 (!%p4276_p4), %s3921_s20, 3 }
  0xba   : > { %s712_s4 = scalar_lea.sflag (!%p4276_p4), [#allocation3], %s3921_s20  ;;  %s715_s6 = scalar_lea.vmem (!%p4276_p4), [#allocation2], %s3924_s2 }
  0xbe   : > { %3524 = dma.done.wait (%p4277_p10), %s712_s4, 128  }
  0xbf   : > { %3526 = vsyncadd (%p4277_p10), %s712_s4, 4294967168  ;;  %s720_s12 = sand.u32 1, %s3723_s29   ;;  %s724_s0 = scalar_lea.vmem [#allocation5], %s3924_s2 }
  0xc0   : > { %s721_s26 = scalar_lea.sflag [#allocation6], %s720_s12 }
  0xc1   : > { %3528 = dma.done.wait (%p4277_p10), %s721_s26, 128  }
  0xc2   : > { %3530 = vsyncadd (%p4277_p10), %s721_s26, 4294967168  ;;  %p4278_p9 = scmp.eq.s32.totalorder %s3723_s29, 0 }
  0xc4   : > { %3532 = dma.done.wait (%p4278_p9), [#allocation6], 1024   ;;  %p4279_p6 = pmov %p4278_p9 }
  0xc6   : > { %3534 = vsyncadd (%p4279_p6), [#allocation6], 4294966272  ;;  %p4280_p8 = pmov %p4279_p6 }
  0xc7   : > { %p4281_p11 = pmov %p4279_p6 }
  0xc8   : > { %3536 = dma.done.wait (%p4280_p8), [#allocation9], 2048  }
  0xc9   : > { %3538 = vsyncadd (%p4281_p11), [#allocation9], 4294965248  ;;  %p4282_p13 = pmov %p4279_p6 }
  0xca   : > { %p4283_p0 = pmov %p4279_p6 }
  0xcb   : > { %3540 = dma.done.wait (%p4282_p13), [#allocation12], 2048  }
  0xcc   : > { %3542 = vsyncadd (%p4283_p0), [#allocation12], 4294965248  ;;  %p4284_p2 = pmov %p4283_p0 }
  0xcd   : > { %p4285_p5 = pmov %p4283_p0 }
  0xce   : > { %3544 = dma.done.wait (%p4284_p2), [#allocation15], 4096  }
  0xcf   : > { %3546 = vsyncadd (%p4285_p5), [#allocation15], 4294963200  ;;  %v3584_v0 = vmov 0.0   ;;  %vm3585_vm0 = vmmov 0   ;;  %v3108_v1 = vld [vmem:[#allocation8 + $0x38] sm:$0xff]   ;;  %v3110_v3 = vld [vmem:[#allocation8 + $0x30] sm:$0xff]  }
  0xd0   : > { %2831 = vmatprep.subr.bf16.mxu1 %v3584_v0  ;;  %2811 = vmatprep.subr.bf16.mxu0 %v3584_v0  ;;  %v3109_v2 = vld [vmem:[#allocation7 + $0x38] sm:$0xff]   ;;  %v3111_v4 = vld [vmem:[#allocation7 + $0x30] sm:$0xff]   ;;  %v3112_v5 = vld [vmem:[#allocation8 + $0x28] sm:$0xff]   ;;  %s4286_s30 = sld [smem:[#allocation38_spill]]  ;;  %vm1163_vm1 = vcmask 261120   ;;  %s3586_s1 = smov 96  }
  0xd1   : > { %2847 = vmatprep.mubr.msk.bf16.mxu1 %vm3585_vm0, %v3584_v0  ;;  %2827 = vmatprep.mubr.msk.bf16.mxu0 %vm3585_vm0, %v3584_v0  ;;  %v3113_v6 = vld [vmem:[#allocation7 + $0x28] sm:$0xff]   ;;  %v3114_v7 = vld [vmem:[#allocation8 + $0x20] sm:$0xff]   ;;  %v3116_v9 = vld [vmem:[#allocation8 + $0x18] sm:$0xff]   ;;  %s4287_s24 = sld [smem:[#allocation36_spill]]  ;;  %vm1210_vm2 = vcmask 64512   ;;  %vm1226_vm3 = vcmask 1043456  }
  0xd2   : > { %2832 = vmatpush3.bf16.msra.mxu1 %v3108_v1  ;;  %2812 = vmatpush3.bf16.msra.mxu0 %v3109_v2  ;;  %v3115_v8 = vld [vmem:[#allocation7 + $0x20] sm:$0xff]   ;;  %v3117_v10 = vld [vmem:[#allocation7 + $0x18] sm:$0xff]   ;;  %v3118_v11 = vld [vmem:[#allocation8 + $0x10] sm:$0xff]   ;;  %s3587_s5 = smov 64   ;;  %s3588_s19 = smov 32  }
  0xd3   : > { %2833 = vmatprep.subr.bf16.mxu1 %v3584_v0  ;;  %2813 = vmatprep.subr.bf16.mxu0 %v3584_v0  ;;  %v3119_v12 = vld [vmem:[#allocation7 + $0x10] sm:$0xff]   ;;  %v3120_v13 = vld [vmem:[#allocation8 + $0x8] sm:$0xff]   ;;  %v3122_v15 = vld [vmem:[#allocation8] sm:$0xff]   ;;  %s813_s16 = scalar_lea.vmem [#allocation17], %s3924_s2  ;;  %s2376_s18 = scalar_lea.sflag [#allocation4], %s3921_s20 }
  0xd4   : > { %v3121_v14 = vld [vmem:[#allocation7 + $0x8] sm:$0xff]   ;;  %v823_v16 = vld [vmem:[%s724_s0] sm:$0xff]  ;;  %v3123_v17 = vld [vmem:[#allocation7] sm:$0xff]   ;;  %s2394_s26 = sshll.u32 %s813_s16, 4  ;;  %p4289_p12 = scmp.ne.s32.totalorder %s4270_s21, 0  ;;  %s2395_s26 = int_to_ptr.vmem [resolvable:$true] %s2394_s26 }
  0xd5   : > { %v3976_v18 = vld [vmem:[%s715_s6] sm:$0xff]  ;;  %v3980_v19 = vpack.c.bf16 %v823_v16, %v823_v16  ;;  %v3124_v37 = vld [vmem:[#allocation10 + $0x38] sm:$0xff]   ;;  %v3125_v38 = vld [vmem:[#allocation10 + $0x30] sm:$0xff]   ;;  %s4288_s6 = sld [smem:[#allocation46_spill]]  ;;  %s3455_s23 = scalar_lea.vmem %s2395_s26, 128 }
  0xd6   : > { %2834 = vmatpush3.bf16.msra.mxu1 %v3110_v3  ;;  %2814 = vmatpush3.bf16.msra.mxu0 %v3111_v4  ;;  %v824_v20 = vpack.c.bf16 %v3976_v18, %v3976_v18  ;;  %v2633_v21 = vld [vmem:[%s4286_s30] ss:$0 sm:$0xff]  ;;  %v3126_v39 = vld [vmem:[#allocation10 + $0x28] sm:$0xff]   ;;  %v3128_v41 = vld [vmem:[#allocation10 + $0x18] sm:$0xff]   ;;  %p3456_p7 = scmp.ne.s32.totalorder %s2395_s26, %s3455_s23 }
  0xd7   : > { %2835 = vmatprep.subr.bf16.mxu1 %v3584_v0  ;;  %2815 = vmatprep.subr.bf16.mxu0 %v3584_v0  ;;  %v2624_v22 = vld [vmem:[%s4287_s24] ss:$0 sm:$0xff]  ;;  %v3129_v42 = vld [vmem:[#allocation10 + $0x10] sm:$0xff]   ;;  %v3130_v43 = vld [vmem:[#allocation10 + $0x8] sm:$0xff]  }
  0xd8   : > { %v3127_v40 = vld [vmem:[#allocation10 + $0x20] sm:$0xff]   ;;  %p3457_p1 = pnand %p3456_p7, %p4289_p12 }
  0xd9   : > { %v3131_v44 = vld [vmem:[#allocation10] sm:$0xff]  }
  0xda   : > { %2836 = vmatpush3.bf16.msra.mxu1 %v3112_v5  ;;  %2816 = vmatpush3.bf16.msra.mxu0 %v3113_v6  ;;  %v2642_v55 = vld [vmem:[%s4206_s7] ss:$0 sm:$0xff]  ;;  %p3458_p3 = pneg %p3457_p1 }
  0xdb   : > { %2837 = vmatprep.subr.bf16.mxu1 %v3584_v0  ;;  %2817 = vmatprep.subr.bf16.mxu0 %v3584_v0 }
  0xde   : > { %2838 = vmatpush3.bf16.msra.mxu1 %v3114_v7  ;;  %2818 = vmatpush3.bf16.msra.mxu0 %v3115_v8 }
  0xdf   : > { %2839 = vmatprep.subr.bf16.mxu1 %v3584_v0  ;;  %2819 = vmatprep.subr.bf16.mxu0 %v3584_v0 }
  0xe2   : > { %2840 = vmatpush3.bf16.msra.mxu1 %v3116_v9  ;;  %2820 = vmatpush3.bf16.msra.mxu0 %v3117_v10 }
  0xe3   : > { %2841 = vmatprep.subr.bf16.mxu1 %v3584_v0  ;;  %2821 = vmatprep.subr.bf16.mxu0 %v3584_v0 }
  0xe6   : > { %2842 = vmatpush3.bf16.msra.mxu1 %v3118_v11  ;;  %2822 = vmatpush3.bf16.msra.mxu0 %v3119_v12 }
  0xe7   : > { %2843 = vmatprep.subr.bf16.mxu1 %v3584_v0  ;;  %2823 = vmatprep.subr.bf16.mxu0 %v3584_v0 }
  0xea   : > { %2844 = vmatpush3.bf16.msra.mxu1 %v3120_v13  ;;  %2824 = vmatpush3.bf16.msra.mxu0 %v3121_v14 }
  0xeb   : > { %2845 = vmatprep.subr.bf16.mxu1 %v3584_v0  ;;  %2825 = vmatprep.subr.bf16.mxu0 %v3584_v0 }
  0xee   : > { %2846 = vmatpush3.bf16.msra.mxu1 %v3122_v15  ;;  %2826 = vmatpush3.bf16.msra.mxu0 %v3123_v17 }
  0xef   : > { %2871 = vmatprep.subr.bf16.mxu1 %v3584_v0  ;;  %2851 = vmatprep.subr.bf16.mxu0 %v3584_v0 }
  0xf1   : > { %2848 = vmatmul.mubr.bf16.vlgmr.msra.gmra.mxu1 %v3980_v19  ;;  %2828 = vmatmul.mubr.bf16.vlgmr.msra.gmra.mxu0 %v824_v20 }
  0xf2   : > { %2873 = vmatprep.mubr.msk.bf16.mxu1 %vm3585_vm0, %v3584_v0  ;;  %2867 = vmatprep.mubr.msk.bf16.mxu0 %vm3585_vm0, %v3584_v0 }
  0xf3   : > { %2852 = vmatpush3.bf16.msra.mxu0 %v3124_v37 }
  0xf4   : > { %2853 = vmatprep.subr.bf16.mxu0 %v3584_v0 }
  0xf7   : > { %2854 = vmatpush3.bf16.msra.mxu0 %v3125_v38  ;;  %v3135_v38 = vld [vmem:[#allocation11] sm:$0xff]  }
  0xf8   : > { %2855 = vmatprep.subr.bf16.mxu0 %v3584_v0 }
  0xfb   : > { %2856 = vmatpush3.bf16.msra.mxu0 %v3126_v39 }
  0xfc   : > { %2857 = vmatprep.subr.bf16.mxu0 %v3584_v0 }
  0xff   : > { %2858 = vmatpush3.bf16.msra.mxu0 %v3127_v40 }
 0x100   : > { %2859 = vmatprep.subr.bf16.mxu0 %v3584_v0 }
 0x103   : > { %2860 = vmatpush3.bf16.msra.mxu0 %v3128_v41 }
 0x104   : > { %2861 = vmatprep.subr.bf16.mxu0 %v3584_v0 }
 0x107   : > { %2862 = vmatpush3.bf16.msra.mxu0 %v3129_v42 }
 0x108   : > { %2863 = vmatprep.subr.bf16.mxu0 %v3584_v0 }
 0x10b   : > { %2864 = vmatpush3.bf16.msra.mxu0 %v3130_v43 }
 0x10c   : > { %2865 = vmatprep.subr.bf16.mxu0 %v3584_v0 }
 0x10f   : > { %2866 = vmatpush3.bf16.msra.mxu0 %v3131_v44 }
 0x110   : > { %2923 = vmatprep.subr.bf16.mxu0 %v3584_v0 }
 0x112   : > { %2868 = vmatmul.mubr.bf16.vlgmr.msra.gmra.mxu0 %v3980_v19 }
 0x113   : > { %2927 = vmatprep.mubr.msk.bf16.mxu0 %vm3585_vm0, %v3584_v0 }
 0x1b1   : > { %v1044_v23 = vpop.f32.mrf.mxu1  ;;  %v931_v25 = vpop.f32.mrf.mxu0 }
 0x1b2   : > { %v1045_v24 = vadd.f32 %v2633_v21, %v1044_v23  ;;  %v932_v26 = vadd.f32 %v2624_v22, %v931_v25 }
 0x1b3   : > { %v2849_v27 = vpop.f32.mrf.mxu1  ;;  %v2829_v29 = vpop.f32.mrf.mxu0 }
 0x1b4   : > { %v3997_v28 = vpack.c.bf16 %v1045_v24, %v1045_v24  ;;  %v937_v30 = vmul.f32 0.17677669, %v932_v26  ;;  %v3132_v29 = vld [vmem:[#allocation11 + $0x18] sm:$0xff]  }
 0x1b5   : > { %v1047_v31 = vpop.f32.mrf.mxu1  ;;  %v934_v32 = vpop.f32.mrf.mxu0 }
 0x1b6   : > { %1279 = vrot.lane.b32.xlu1 %v3997_v28, %s3586_s1  ;;  %v1168_v33 = vsel %vm1163_vm1, %v3997_v28, 0  ;;  %v4003_v34 = vpack.c.bf16 %v937_v30, %v937_v30  ;;  %v3133_v31 = vld [vmem:[#allocation11 + $0x10] sm:$0xff]  }
 0x1b7   : > { %v2850_v35 = vpop.f32.mrf.mxu1  ;;  %2872 = vmatpush3.bf16.xpose.msra.mxu1 %v1168_v33  ;;  %v2830_v36 = vpop.f32.mrf.mxu0  ;;  %v3134_v33 = vld [vmem:[#allocation11 + $0x8] sm:$0xff]  }
 0x1b8   : > { %2877 = vmatprep.subr.bf16.mxu1 %v3584_v0 }
 0x1ba   : > { %1276 = vrot.lane.b32.xlu1 %v4003_v34, %s3586_s1 }
 0x1be   : > { %2874 = vmatmul.mubr.msk.bf16.vlgmr.msra.gmra.mxu1 %vm1163_vm1, %v4003_v34 }
 0x1bf   : > { %2879 = vmatprep.mubr.msk.bf16.mxu1 %vm3585_vm0, %v3584_v0 }
 0x1d2   : > { %v1156_v56 = vpop.f32.mrf.mxu0 }
 0x1d3   : > { %v1157_v57 = vadd.f32 %v2642_v55, %v1156_v56 }
 0x1d4   : > { %v2869_v58 = vpop.f32.mrf.mxu0 }
 0x1d5   : > { %v4028_v59 = vpack.c.bf16 %v1157_v57, %v1157_v57 }
 0x1d6   : > { %v1159_v60 = vpop.f32.mrf.mxu0 }
 0x1d7   : > { %v1228_v61 = vsel %vm1226_vm3, %v4028_v59, 0 }
 0x1d8   : > { %v2870_v62 = vpop.f32.mrf.mxu0  ;;  %2878 = vmatpush3.bf16.msra.mxu1 %v1228_v61 }
 0x1d9   : > { %2883 = vmatprep.subr.bf16.mxu1 %v3584_v0 }
 0x228   : > { %v1280_v3 = vpop.permute.xlu1 %1279 }
 0x229   : > { %v1285_v5 = vsel %vm1163_vm1, %v1280_v3, 0  ;;  %v3136_v3 = vld [vmem:[#allocation11 + $0x28] sm:$0xff]  }
 0x22a   : > { %2924 = vmatpush3.bf16.msra.mxu0 %v3136_v3 }
 0x22b   : > { %2925 = vmatprep.subr.bf16.mxu0 %v3584_v0 }
 0x22c   : > { %v1277_v6 = vpop.permute.xlu1 %1276 }
 0x27e   : > { %v1204_v45 = vpop.f32.mrf.mxu1 }
 0x27f   : > { %v1211_v46 = vsel %vm1210_vm2, %v1204_v45, -inf }
 0x280   : > { %1212 = vmax.xlane.f32.xlu0 %v1211_v46  ;;  %v2875_v47 = vpop.f32.mrf.mxu1 }
 0x282   : > { %v1207_v48 = vpop.f32.mrf.mxu1 }
 0x284   : > { %v2876_v49 = vpop.f32.mrf.mxu1 }
 0x309   : > { %v1213_v50 = vpop.xlane.xlu0 %1212 }
 0x30a   : > { %v1214_v51 = vsub.f32 %v1204_v45, %v1213_v50 }
 0x30c   : > { %v1215_v52 = vmul.f32 1.442695, %v1214_v51 }
 0x30e   : > { %3188 = vpow2.f32 %v1215_v52 }
 0x31b   : > { %v3189_v53 = vpop.eup %3188 }
 0x31c   : > { %v1217_v54 = vsel %vm1210_vm2, %v3189_v53, 0.0 }
 0x31d   : > { %1218 = vadd.xlane.f32.xlu0 %v1217_v54 }
 0x3a6   : > { %v1219_v63 = vpop.xlane.xlu0 %1218 }
 0x3a7   : > { %3190 = vrcp.f32 %v1219_v63 }
 0x3b4   : > { %v3191_v1 = vpop.eup %3190 }
 0x3b5   : > { %v1221_v2 = vmul.f32 %v3191_v1, %v3189_v53 }
 0x3b7   : > { %v1222_v4 = vpack.c.bf16 %v1221_v2, %v1221_v2 }
 0x3b9   : > { %2880 = vmatmul.mubr.msk.bf16.vlgmr.msra.gmra.mxu1 %vm1210_vm2, %v1222_v4 }
 0x3ba   : > { %2884 = vmatpush3.bf16.xpose.msra.mxu1 %v1285_v5  ;;  %2885 = vmatprep.mubr.msk.bf16.mxu1 %vm3585_vm0, %v3584_v0 }
 0x3bb   : > { %2889 = vmatprep.subr.bf16.mxu1 %v3584_v0 }
 0x3c1   : > { %2886 = vmatmul.mubr.msk.bf16.vlgmr.msra.gmra.mxu1 %vm1163_vm1, %v1277_v6 }
 0x3c2   : > { %2891 = vmatprep.mubr.msk.bf16.mxu1 %vm3585_vm0, %v3584_v0 }
 0x479   : > { %v1264_v7 = vpop.f32.mrf.mxu1 }
 0x47a   : > { %v1270_v41 = vpack.c.bf16 %v1264_v7, %v1264_v7 }
 0x47b   : > { %v2881_v8 = vpop.f32.mrf.mxu1 }
 0x47d   : > { %v1267_v9 = vpop.f32.mrf.mxu1 }
 0x47f   : > { %v2882_v10 = vpop.f32.mrf.mxu1 }
 0x481   : > { %v1321_v11 = vpop.f32.mrf.mxu1 }
 0x482   : > { %v1327_v12 = vsel %vm1210_vm2, %v1321_v11, -inf }
 0x483   : > { %1328 = vmax.xlane.f32.xlu0 %v1327_v12  ;;  %v2887_v13 = vpop.f32.mrf.mxu1 }
 0x485   : > { %v1324_v14 = vpop.f32.mrf.mxu1 }
 0x487   : > { %v2888_v15 = vpop.f32.mrf.mxu1 }
 0x499   : > { %1340 = vrot.lane.b32.xlu0 %v4028_v59, %s3586_s1 }
 0x49d   : > { %1505 = vrot.lane.b32.xlu0 %v3997_v28, %s3587_s5 }
 0x4a1   : > { %1503 = vrot.lane.b32.xlu0 %v4003_v34, %s3587_s5 }
 0x50c   : > { %v1329_v16 = vpop.xlane.xlu0 %1328 }
 0x50d   : > { %v1330_v17 = vsub.f32 %v1321_v11, %v1329_v16 }
 0x50f   : > { %v1331_v20 = vmul.f32 1.442695, %v1330_v17 }
 0x510   : > { %v1341_v21 = vpop.permute.xlu0 %1340 }
 0x511   : > { %3192 = vpow2.f32 %v1331_v20  ;;  %v1346_v22 = vsel %vm1226_vm3, %v1341_v21, 0 }
 0x512   : > { %2890 = vmatpush3.bf16.msra.mxu1 %v1346_v22 }
 0x513   : > { %2895 = vmatprep.subr.bf16.mxu1 %v3584_v0 }
 0x514   : > { %v1506_v40 = vpop.permute.xlu0 %1505 }
 0x515   : > { %v1511_v42 = vsel %vm1163_vm1, %v1506_v40, 0  ;;  %v3139_v40 = vld [vmem:[#allocation11 + $0x30] sm:$0xff]  }
 0x518   : > { %v1504_v44 = vpop.permute.xlu0 %1503 }
 0x51e   : > { %v3193_v23 = vpop.eup %3192 }
 0x51f   : > { %v1333_v24 = vsel %vm1210_vm2, %v3193_v23, 0.0 }
 0x520   : > { %1334 = vadd.xlane.f32.xlu1 %v1333_v24 }
 0x531   : > { %1565 = vrot.lane.b32.xlu1 %v4028_v59, %s3587_s5  ;;  %s2721_s5 = sshll.u32 %s3723_s29, 7 }
 0x532   : > { %s2392_s12 = scalar_lea.hbm %s4288_s6, %s2721_s5 }
 0x5a9   : > { %v1335_v25 = vpop.xlane.xlu1 %1334 }
 0x5aa   : > { %3194 = vrcp.f32 %v1335_v25 }
 0x5ad   : > { %v1566_v43 = vpop.permute.xlu1 %1565 }
 0x5ae   : > { %v1571_v45 = vsel %vm1226_vm3, %v1566_v43, 0 }
 0x5b7   : > { %v3195_v26 = vpop.eup %3194 }
 0x5b8   : > { %v1337_v27 = vmul.f32 %v3195_v26, %v3193_v23 }
 0x5ba   : > { %v1338_v30 = vpack.c.bf16 %v1337_v27, %v1337_v27 }
 0x5bc   : > { %2892 = vmatmul.mubr.msk.bf16.vlgmr.msra.gmra.mxu1 %vm1210_vm2, %v1338_v30 }
 0x5bd   : > { %2896 = vmatpush3.bf16.msra.mxu1 %v3132_v29  ;;  %2899 = vmatprep.mubr.msk.bf16.mxu1 %vm3585_vm0, %v3584_v0 }
 0x5be   : > { %2897 = vmatprep.subr.bf16.mxu1 %v3584_v0 }
 0x5c1   : > { %2898 = vmatpush3.bf16.msra.mxu1 %v3133_v31  ;;  %v3138_v31 = vld [vmem:[#allocation11 + $0x38] sm:$0xff]  }
 0x5c2   : > { %2903 = vmatprep.subr.bf16.mxu1 %v3584_v0 }
 0x67c   : > { %v1382_v32 = vpop.f32.mrf.mxu1 }
 0x67d   : > { %v1388_v35 = vpack.c.bf16 %v1382_v32, %v1382_v32 }
 0x67e   : > { %v2893_v36 = vpop.f32.mrf.mxu1 }
 0x67f   : > { %2900 = vmatmul.mubr.msk.bf16.vlgmr.msra.gmra.mxu1 %vm1163_vm1, %v1388_v35 }
 0x680   : > { %2904 = vmatpush3.bf16.msra.mxu1 %v3134_v33  ;;  %v1385_v37 = vpop.f32.mrf.mxu1  ;;  %2907 = vmatprep.mubr.msk.bf16.mxu1 %vm3585_vm0, %v3584_v0 }
 0x681   : > { %2905 = vmatprep.subr.bf16.mxu1 %v3584_v0 }
 0x682   : > { %v2894_v39 = vpop.f32.mrf.mxu1 }
 0x684   : > { %2906 = vmatpush3.bf16.msra.mxu1 %v3135_v38 }
 0x685   : > { %2911 = vmatprep.subr.bf16.mxu1 %v3584_v0 }
 0x687   : > { %2908 = vmatmul.mubr.msk.bf16.vlgmr.msra.gmra.mxu1 %vm1163_vm1, %v1270_v41 }
 0x688   : > { %2912 = vmatpush3.bf16.xpose.msra.mxu1 %v1511_v42  ;;  %2913 = vmatprep.mubr.msk.bf16.mxu1 %vm3585_vm0, %v3584_v0 }
 0x689   : > { %2917 = vmatprep.subr.bf16.mxu1 %v3584_v0 }
 0x68f   : > { %2914 = vmatmul.mubr.msk.bf16.vlgmr.msra.gmra.mxu1 %vm1163_vm1, %v1504_v44 }
 0x690   : > { %2918 = vmatpush3.bf16.msra.mxu1 %v1571_v45  ;;  %2919 = vmatprep.mubr.msk.bf16.mxu1 %vm3585_vm0, %v3584_v0 }
 0x691   : > { %2931 = vmatprep.subr.bf16.mxu1 %v3584_v0 }
 0x73f   : > { %v1442_v46 = vpop.f32.mrf.mxu1 }
 0x741   : > { %v2901_v47 = vpop.f32.mrf.mxu1 }
 0x742   : > { %v3142_v47 = vld [vmem:[#allocation14 + $0x74] ss:$8 sps:$4 sm:$0xff]  }
 0x743   : > { %v1445_v48 = vpop.f32.mrf.mxu1 }
 0x744   : > { %v3145_v48 = vld [vmem:[#allocation14 + $0x64] ss:$8 sps:$4 sm:$0xff]  }
 0x745   : > { %v2902_v49 = vpop.f32.mrf.mxu1 }
 0x746   : > { %v3143_v49 = vld [vmem:[#allocation14 + $0x60] ss:$8 sps:$4 sm:$0xff]  }
 0x747   : > { %v1497_v50 = vpop.f32.mrf.mxu1 }
 0x748   : > { %v4070_v51 = vadd.f32 %v1497_v50, %v1442_v46  ;;  %v3140_v46 = vld [vmem:[#allocation14 + $0x70] ss:$8 sps:$4 sm:$0xff]   ;;  %v3148_v50 = vld [vmem:[#allocation14 + $0x54] ss:$8 sps:$4 sm:$0xff]  }
 0x749   : > { %v2909_v52 = vpop.f32.mrf.mxu1 }
 0x74a   : > { %v3146_v52 = vld [vmem:[#allocation14 + $0x50] ss:$8 sps:$4 sm:$0xff]  }
 0x74b   : > { %v1500_v53 = vpop.f32.mrf.mxu1 }
 0x74c   : > { %v3151_v53 = vld [vmem:[#allocation14 + $0x44] ss:$8 sps:$4 sm:$0xff]  }
 0x74d   : > { %v2910_v54 = vpop.f32.mrf.mxu1 }
 0x74e   : > { %v3149_v54 = vld [vmem:[#allocation14 + $0x40] ss:$8 sps:$4 sm:$0xff]  }
 0x74f   : > { %v1547_v55 = vpop.f32.mrf.mxu1 }
 0x750   : > { %v1553_v56 = vsel %vm1210_vm2, %v1547_v55, -inf }
 0x751   : > { %1554 = vmax.xlane.f32.xlu0 %v1553_v56  ;;  %v2915_v57 = vpop.f32.mrf.mxu1  ;;  %v3152_v56 = vld [vmem:[#allocation14 + $0x30] ss:$8 sps:$4 sm:$0xff]  }
 0x752   : > { %v3157_v57 = vld [vmem:[#allocation14 + $0x24] ss:$8 sps:$4 sm:$0xff]  }
 0x753   : > { %v1550_v58 = vpop.f32.mrf.mxu1 }
 0x754   : > { %v3155_v58 = vld [vmem:[#allocation14 + $0x20] ss:$8 sps:$4 sm:$0xff]  }
 0x755   : > { %v2916_v60 = vpop.f32.mrf.mxu1 }
 0x756   : > { %v3160_v60 = vld [vmem:[#allocation14 + $0x14] ss:$8 sps:$4 sm:$0xff]  }
 0x7da   : > { %v1555_v61 = vpop.xlane.xlu0 %1554 }
 0x7db   : > { %v1556_v62 = vsub.f32 %v1547_v55, %v1555_v61  ;;  %v3154_v55 = vld [vmem:[#allocation14 + $0x34] ss:$8 sps:$4 sm:$0xff]   ;;  %v3158_v61 = vld [vmem:[#allocation14 + $0x10] ss:$8 sps:$4 sm:$0xff]  }
 0x7dd   : > { %v1557_v63 = vmul.f32 1.442695, %v1556_v62  ;;  %v3163_v62 = vld [vmem:[#allocation14 + $0x4] ss:$8 sps:$4 sm:$0xff]  }
 0x7df   : > { %3196 = vpow2.f32 %v1557_v63  ;;  %v3161_v63 = vld [vmem:[#allocation14] ss:$8 sps:$4 sm:$0xff]  }
 0x7ec   : > { %v3197_v1 = vpop.eup %3196 }
 0x7ed   : > { %v1559_v2 = vsel %vm1210_vm2, %v3197_v1, 0.0 }
 0x7ee   : > { %1560 = vadd.xlane.f32.xlu1 %v1559_v2  ;;  %v2671_v2 = vld [vmem:[%s4208_s9] ss:$0 sm:$0xff] }
 0x7ff   : > { %1676 = vrot.lane.b32.xlu1 %v3997_v28, %s3588_s19 }
 0x803   : > { %1674 = vrot.lane.b32.xlu1 %v4003_v34, %s3588_s19  ;;  %v3137_v34 = vld [vmem:[#allocation11 + $0x20] sm:$0xff]  }
 0x804   : > { %2926 = vmatpush3.bf16.msra.mxu0 %v3137_v34 }
 0x805   : > { %2937 = vmatprep.subr.bf16.mxu0 %v3584_v0 }
 0x877   : > { %v1561_v4 = vpop.xlane.xlu1 %1560 }
 0x878   : > { %3198 = vrcp.f32 %v1561_v4 }
 0x87b   : > { %v1677_v7 = vpop.permute.xlu1 %1676 }
 0x87c   : > { %v1682_v9 = vsel %vm1163_vm1, %v1677_v7, 0 }
 0x87f   : > { %v1675_v28 = vpop.permute.xlu1 %1674 }
 0x885   : > { %v3199_v5 = vpop.eup %3198 }
 0x886   : > { %v1563_v6 = vmul.f32 %v3199_v5, %v3197_v1 }
 0x888   : > { %v1564_v8 = vpack.c.bf16 %v1563_v6, %v1563_v6 }
 0x88a   : > { %2920 = vmatmul.mubr.msk.bf16.vlgmr.msra.gmra.mxu1 %vm1210_vm2, %v1564_v8 }
 0x88b   : > { %2932 = vmatpush3.bf16.xpose.msra.mxu1 %v1682_v9  ;;  %2933 = vmatprep.mubr.msk.bf16.mxu1 %vm3585_vm0, %v3584_v0  ;;  %v3164_v9 = vld [vmem:[#allocation13 + $0x38] sm:$0xff]  }
 0x88c   : > { %2943 = vmatprep.subr.bf16.mxu1 %v3584_v0 }
 0x892   : > { %2934 = vmatmul.mubr.msk.bf16.vlgmr.msra.gmra.mxu1 %vm1163_vm1, %v1675_v28  ;;  %v3165_v28 = vld [vmem:[#allocation13 + $0x30] sm:$0xff]  }
 0x893   : > { %2947 = vmatprep.mubr.msk.bf16.mxu1 %vm3585_vm0, %v3584_v0  ;;  %2944 = vmatpush3.bf16.msra.mxu1 %v3138_v31 }
 0x894   : > { %2945 = vmatprep.subr.bf16.mxu1 %v3584_v0 }
 0x897   : > { %2946 = vmatpush3.bf16.msra.mxu1 %v3139_v40 }
 0x898   : > { %2108 = vmatprep.subr.bf16.mxu1 %v3142_v47 }
 0x94a   : > { %v1607_v10 = vpop.f32.mrf.mxu1 }
 0x94b   : > { %v1613_v11 = vpack.c.bf16 %v1607_v10, %v1607_v10 }
 0x94c   : > { %v2921_v12 = vpop.f32.mrf.mxu1 }
 0x94d   : > { %2928 = vmatmul.mubr.msk.bf16.vlgmr.msra.gmra.mxu0 %vm1163_vm1, %v1613_v11 }
 0x94e   : > { %v1610_v13 = vpop.f32.mrf.mxu1  ;;  %2939 = vmatprep.mubr.msk.bf16.mxu0 %vm3585_vm0, %v3584_v0 }
 0x950   : > { %v2922_v14 = vpop.f32.mrf.mxu1 }
 0x952   : > { %v1718_v15 = vpop.f32.mrf.mxu1 }
 0x953   : > { %v1724_v16 = vsel %vm1210_vm2, %v1718_v15, -inf }
 0x954   : > { %1725 = vmax.xlane.f32.xlu0 %v1724_v16  ;;  %v2935_v17 = vpop.f32.mrf.mxu1  ;;  %v3167_v16 = vld [vmem:[#allocation13 + $0x20] sm:$0xff]  }
 0x955   : > { %v3168_v17 = vld [vmem:[#allocation13 + $0x18] sm:$0xff]  }
 0x956   : > { %v1721_v20 = vpop.f32.mrf.mxu1 }
 0x957   : > { %v3169_v20 = vld [vmem:[#allocation13 + $0x10] sm:$0xff]  }
 0x958   : > { %v2936_v21 = vpop.f32.mrf.mxu1 }
 0x959   : > { %v3170_v21 = vld [vmem:[#allocation13 + $0x8] sm:$0xff]  }
 0x96a   : > { %1736 = vrot.lane.b32.xlu0 %v4028_v59, %s3588_s19 }
 0x9dd   : > { %v1726_v22 = vpop.xlane.xlu0 %1725 }
 0x9de   : > { %v1727_v23 = vsub.f32 %v1718_v15, %v1726_v22  ;;  %v3171_v22 = vld [vmem:[#allocation13] sm:$0xff]  }
 0x9e0   : > { %v1728_v24 = vmul.f32 1.442695, %v1727_v23  ;;  %v3172_v23 = vld [vmem:[#allocation16 + $0x78] sm:$0xff]  }
 0x9e1   : > { %v1737_v25 = vpop.permute.xlu0 %1736 }
 0x9e2   : > { %3200 = vpow2.f32 %v1728_v24  ;;  %v1742_v26 = vsel %vm1226_vm3, %v1737_v25, 0  ;;  %v2018_v24 = vlaneseq }
 0x9e3   : > { %2938 = vmatpush3.bf16.msra.mxu0 %v1742_v26 }
 0x9e4   : > { %2951 = vmatprep.subr.bf16.mxu0 %v3584_v0  ;;  %v2019_v25 = vshrl.u32 %v2018_v24, 7  ;;  %v2700_v24 = vld [vmem:[%s4216_s17] ss:$0 sm:$0xff] }
 0x9e6   : > { %v2024_v26 = vsub.s32 1, %v2019_v25 }
 0x9ef   : > { %v3201_v27 = vpop.eup %3200 }
 0x9f0   : > { %v1730_v29 = vsel %vm1210_vm2, %v3201_v27, 0.0 }
 0x9f1   : > { %1731 = vadd.xlane.f32.xlu1 %v1730_v29 }
 0xa0d   : > { %v1667_v30 = vpop.f32.mrf.mxu0 }
 0xa0e   : > { %v1673_v32 = vadd.f32 %v1667_v30, %v4070_v51  ;;  %v3589_v51 = vmov 0  }
 0xa0f   : > { %v2929_v33 = vpop.f32.mrf.mxu0 }
 0xa11   : > { %v1670_v59 = vpop.f32.mrf.mxu0 }
 0xa13   : > { %v2930_v35 = vpop.f32.mrf.mxu0 }
 0xa7a   : > { %v1732_v36 = vpop.xlane.xlu1 %1731 }
 0xa7b   : > { %3202 = vrcp.f32 %v1732_v36  ;;  %v2020_v36 = vsub.s32 0, %v2019_v25 }
 0xa88   : > { %v3203_v37 = vpop.eup %3202 }
 0xa89   : > { %v1734_v38 = vmul.f32 %v3203_v37, %v3201_v27  ;;  %v2016_v27 = vld [vmem:[%s4214_s15] sm:$0x3] }
 0xa8a   : > { %v2025_v29 = vrot.slane %v2016_v27, %v2024_v26  ;;  %v2021_v37 = vrot.slane %v2016_v27, %v2020_v36 }
 0xa8b   : > { %v1735_v39 = vpack.c.bf16 %v1734_v38, %v1734_v38 }
 0xa8d   : > { %2940 = vmatmul.mubr.msk.bf16.vlgmr.msra.gmra.mxu0 %vm1210_vm2, %v1735_v39 }
 0xa8e   : > { %2967 = vmatprep.mubr.msk.bf16.mxu0 %vm3585_vm0, %v3584_v0  ;;  %2952 = vmatpush3.bf16.msra.mxu0 %v3164_v9 }
 0xa8f   : > { %2953 = vmatprep.subr.bf16.mxu0 %v3584_v0 }
 0xa92   : > { %2954 = vmatpush3.bf16.msra.mxu0 %v3165_v28  ;;  %v3185_v28 = vld [vmem:[#allocation16 + $0x8] sm:$0xff]  }
 0xa93   : > { %2955 = vmatprep.subr.bf16.mxu0 %v3584_v0 }
 0xb4d   : > { %v1778_v41 = vpop.f32.mrf.mxu0 }
 0xb4e   : > { %v1784_v42 = vpack.c.bf16 %v1778_v41, %v1778_v41 }
 0xb4f   : > { %v2941_v43 = vpop.f32.mrf.mxu0 }
 0xb50   : > { %2948 = vmatmul.mubr.msk.bf16.vlgmr.msra.gmra.mxu1 %vm1163_vm1, %v1784_v42 }
 0xb51   : > { %v1781_v44 = vpop.f32.mrf.mxu0  ;;  %2109 = vmatpush1.bf16.msra.mxu1 %v3140_v46  ;;  %2140 = vmatprep.mubr.bf16.mxu1 %v3589_v51 }
 0xb52   : > { %2110 = vmatprep.subr.bf16.mxu1 %v3145_v48  ;;  %v2672_v48 = vld [vmem:[%s4209_s10] ss:$0 sm:$0xff] }
 0xb53   : > { %v2942_v45 = vpop.f32.mrf.mxu0 }
 0xb55   : > { %2111 = vmatpush1.bf16.msra.mxu1 %v3143_v49 }
 0xb56   : > { %2112 = vmatprep.subr.bf16.mxu1 %v3148_v50  ;;  %v2673_v50 = vld [vmem:[%s4210_s11] ss:$0 sm:$0xff] }
 0xb59   : > { %2113 = vmatpush1.bf16.msra.mxu1 %v3146_v52 }
 0xb5a   : > { %2114 = vmatprep.subr.bf16.mxu1 %v3151_v53 }
 0xb5d   : > { %2115 = vmatpush1.bf16.msra.mxu1 %v3149_v54 }
 0xb5e   : > { %2116 = vmatprep.subr.bf16.mxu1 %v3154_v55  ;;  %v3173_v55 = vld [vmem:[#allocation16 + $0x38] sm:$0xff]  }
 0xb61   : > { %2117 = vmatpush1.bf16.msra.mxu1 %v3152_v56 }
 0xb62   : > { %2118 = vmatprep.subr.bf16.mxu1 %v3157_v57 }
 0xb65   : > { %2119 = vmatpush1.bf16.msra.mxu1 %v3155_v58 }
 0xb66   : > { %2120 = vmatprep.subr.bf16.mxu1 %v3160_v60  ;;  %v3174_v60 = vld [vmem:[#allocation16 + $0x70] sm:$0xff]  }
 0xb69   : > { %2121 = vmatpush1.bf16.msra.mxu1 %v3158_v61  ;;  %v3175_v61 = vld [vmem:[#allocation16 + $0x30] sm:$0xff]  }
 0xb6a   : > { %2122 = vmatprep.subr.bf16.mxu1 %v3163_v62  ;;  %v3176_v62 = vld [vmem:[#allocation16 + $0x68] sm:$0xff]  }
 0xb6d   : > { %2123 = vmatpush1.bf16.msra.mxu1 %v3161_v63  ;;  %v3177_v63 = vld [vmem:[#allocation16 + $0x28] sm:$0xff]  }
 0xb70   : > { %2141 = vmatmul.mubr.bf16.vlgmr.msra.gmra.mxu1 %v3980_v19 }
 0xc10   : > { %v1838_v1 = vpop.f32.mrf.mxu1 }
 0xc11   : > { %v1844_v3 = vadd.f32 %v1838_v1, %v1673_v32  ;;  %v3178_v1 = vld [vmem:[#allocation16 + $0x60] sm:$0xff]  }
 0xc12   : > { %v2949_v4 = vpop.f32.mrf.mxu1 }
 0xc13   : > { %v1852_v5 = vadd.f32 %v2671_v2, %v1844_v3  ;;  %v3179_v2 = vld [vmem:[#allocation16 + $0x20] sm:$0xff]   ;;  %v3180_v3 = vld [vmem:[#allocation16 + $0x58] sm:$0xff]  }
 0xc14   : > { %v1841_v6 = vpop.f32.mrf.mxu1  ;;  %v3181_v4 = vld [vmem:[#allocation16 + $0x18] sm:$0xff]  }
 0xc15   : > { %v1853_v7 = vadd.f32 %v1852_v5, %v3976_v18  ;;  %v3166_v18 = vld [vmem:[#allocation13 + $0x28] sm:$0xff]   ;;  %v3182_v5 = vld [vmem:[#allocation16 + $0x50] sm:$0xff]  }
 0xc16   : > { %v2950_v8 = vpop.f32.mrf.mxu1  ;;  %2956 = vmatpush3.bf16.msra.mxu0 %v3166_v18 }
 0xc17   : > { %1856 = vadd.xlane.f32.xlu0 %v1853_v7  ;;  %2957 = vmatprep.subr.bf16.mxu0 %v3584_v0  ;;  %v3184_v8 = vld [vmem:[#allocation16 + $0x48] sm:$0xff]  }
 0xc1a   : > { %2958 = vmatpush3.bf16.msra.mxu0 %v3167_v16 }
 0xc1b   : > { %2959 = vmatprep.subr.bf16.mxu0 %v3584_v0 }
 0xc1e   : > { %2960 = vmatpush3.bf16.msra.mxu0 %v3168_v17 }
 0xc1f   : > { %2961 = vmatprep.subr.bf16.mxu0 %v3584_v0 }
 0xc22   : > { %2962 = vmatpush3.bf16.msra.mxu0 %v3169_v20 }
 0xc23   : > { %2963 = vmatprep.subr.bf16.mxu0 %v3584_v0 }
 0xc26   : > { %2964 = vmatpush3.bf16.msra.mxu0 %v3170_v21 }
 0xc27   : > { %2965 = vmatprep.subr.bf16.mxu0 %v3584_v0 }
 0xc2a   : > { %2966 = vmatpush3.bf16.msra.mxu0 %v3171_v22 }
 0xc2b   : > { %2789 = vmatprep.subr.bf16.mxu0 %v3172_v23 }
 0xc30   : > { %v2142_v19 = vpop.f32.mrf.mxu1 }
 0xc31   : > { %v2143_v40 = vadd.f32 %v2142_v19, %v2021_v37  ;;  %v3186_v19 = vld [vmem:[#allocation16 + $0x40] sm:$0xff]  }
 0xc32   : > { %v2144_v34 = vpop.f32.mrf.mxu1 }
 0xc33   : > { %v2145_v30 = vadd.f32 %v2144_v34, %v2025_v29  ;;  %v2149_v42 = vmul.f32 %v2143_v40, %v2143_v40 }
 0xc34   : > { %v2146_v10 = vpop.f32.mrf.mxu1 }
 0xc35   : > { %v2150_v31 = vmul.f32 %v2145_v30, %v2145_v30  ;;  %v2151_v44 = vmul.f32 %v2149_v42, %v2143_v40  ;;  %v3187_v10 = vld [vmem:[#allocation16] sm:$0xff]  }
 0xc36   : > { %v2147_v11 = vpop.f32.mrf.mxu1 }
 0xc37   : > { %v2152_v32 = vmul.f32 %v2150_v31, %v2145_v30  ;;  %v2153_v46 = vmul.f32 0.044715, %v2151_v44 }
 0xc39   : > { %v2154_v33 = vmul.f32 0.044715, %v2152_v32  ;;  %v2155_v52 = vadd.f32 %v2153_v46, %v2143_v40 }
 0xc3b   : > { %v2156_v59 = vadd.f32 %v2154_v33, %v2145_v30  ;;  %v2157_v57 = vmul.f32 0.7978846, %v2155_v52  ;;  %v3216_v33 = vld [vmem:[%s724_s0] sm:$0xff]  ;;  %s3590_s0 = smov [#allocation17]  }
 0xc3c   : > { %s3459_s30 = sshll.u32 %s3590_s0, 4  ;;  %s3460_s30 = int_to_ptr.vmem [resolvable:$false] %s3459_s30 }
 0xc3d   : > { %v2158_v35 = vmul.f32 0.7978846, %v2156_v59  ;;  %s3461_s14 = scalar_lea.vmem %s3460_s30, 256  ;;  %p3462_p4 = scmp.lt.s32.totalorder %s2395_s26, %s3460_s30 }
 0xc3e   : > { %p3463_p10 = scmp.lt.s32.totalorder %s3461_s14, %s3455_s23 }
 0xc3f   : > { %3204 = vtanh.f32 %v2158_v35 }
 0xc40   : > { %p3464_p9 = por %p3463_p10, %p3462_p4 }
 0xc42   : > { %p3465_p6 = pnand %p3464_p9, %p3458_p3 }
 0xc4c   : > { %v3205_v41 = vpop.eup %3204 }
 0xc4d   : > { %v2162_v43 = vadd.f32 1.0, %v3205_v41 }
 0xc4f   : > { %v2164_v45 = vmul.f32 0.5, %v2162_v43 }
 0xc51   : > { %v2166_v51 = vmul.f32 %v2164_v45, %v2145_v30 }
 0xc53   : > { %v2168_v56 = vpack.c.bf16 %v2166_v51, %v2166_v51 }
 0xca0   : > { %v1857_v12 = vpop.xlane.xlu0 %1856 }
 0xca1   : > { %v1859_v13 = vmul.f32 0.0078125, %v1857_v12 }
 0xca3   : > { %v1860_v14 = vsub.f32 %v1853_v7, %v1859_v13  ;;  %v3183_v7 = vld [vmem:[#allocation16 + $0x10] sm:$0xff]   ;;  %v2674_v13 = vld [vmem:[%s4212_s13] ss:$0 sm:$0xff] }
 0xca5   : > { %v1861_v15 = vmul.f32 %v1860_v14, %v1860_v14 }
 0xca7   : > { %1862 = vadd.xlane.f32.xlu1 %v1861_v15 }
 0xd30   : > { %v1863_v0 = vpop.xlane.xlu1 %1862 }
 0xd31   : > { %v1864_v38 = vmul.f32 0.0078125, %v1863_v0 }
 0xd33   : > { %v1865_v39 = vadd.f32 1e-05, %v1864_v38 }
 0xd35   : > { %3206 = vrsqrt.f32 %v1865_v39 }
 0xd36   : > { %3208 = vtanh.f32 %v2157_v57 }
 0xd42   : > { %v3207_v47 = vpop.eup %3206 }
 0xd43   : > { %v1867_v49 = vmul.f32 %v3207_v47, %v1860_v14  ;;  %v3209_v6 = vpop.eup %3208 }
 0xd44   : > { %v2161_v9 = vadd.f32 1.0, %v3209_v6 }
 0xd45   : > { %v1874_v53 = vmul.f32 %v2672_v48, %v1867_v49 }
 0xd46   : > { %v2163_v34 = vmul.f32 0.5, %v2161_v9 }
 0xd47   : > { %v1881_v54 = vadd.f32 %v2673_v50, %v1874_v53 }
 0xd48   : > { %v2165_v11 = vmul.f32 %v2163_v34, %v2143_v40 }
 0xd49   : > { %v1882_v58 = vpack.c.bf16 %v1881_v54, %v1881_v54  ;;  %2373 = vst [vmem:[%s813_s16] sm:$0xff] %v1881_v54 }
 0xd4a   : > { %v2167_v12 = vpack.c.bf16 %v2165_v11, %v2165_v11 }
 0xd4b   : > { %2968 = vmatmul.mubr.bf16.vlgmr.msra.gmra.mxu0 %v1882_v58 }
 0xd4c   : > { %2790 = vmatpush3.bf16.msra.mxu0 %v3173_v55  ;;  %2336 = vmatprep.mubr.bf16.mxu0 %v2168_v56 }
 0xd4d   : > { %2791 = vmatprep.subr.bf16.mxu0 %v3174_v60 }
 0xd50   : > { %2792 = vmatpush3.bf16.msra.mxu0 %v3175_v61 }
 0xd51   : > { %2793 = vmatprep.subr.bf16.mxu0 %v3176_v62 }
 0xd54   : > { %2794 = vmatpush3.bf16.msra.mxu0 %v3177_v63 }
 0xd55   : > { %2795 = vmatprep.subr.bf16.mxu0 %v3178_v1 }
 0xd58   : > { %2796 = vmatpush3.bf16.msra.mxu0 %v3179_v2 }
 0xd59   : > { %2797 = vmatprep.subr.bf16.mxu0 %v3180_v3 }
 0xd5c   : > { %2798 = vmatpush3.bf16.msra.mxu0 %v3181_v4 }
 0xd5d   : > { %2799 = vmatprep.subr.bf16.mxu0 %v3182_v5 }
 0xd60   : > { %2800 = vmatpush3.bf16.msra.mxu0 %v3183_v7 }
 0xd61   : > { %2801 = vmatprep.subr.bf16.mxu0 %v3184_v8 }
 0xd64   : > { %2802 = vmatpush3.bf16.msra.mxu0 %v3185_v28 }
 0xd65   : > { %2803 = vmatprep.subr.bf16.mxu0 %v3186_v19 }
 0xd68   : > { %2804 = vmatpush3.bf16.msra.mxu0 %v3187_v10 }
 0xd6b   : > { %2337 = vmatmul.mubr.bf16.vlgmr.msra.gmra.mxu0 %v2167_v12 }
 0xe0b   : > { %v1988_v14 = vpop.f32.mrf.mxu0 }
 0xe0c   : > { %v1989_v15 = vadd.f32 %v2674_v13, %v1988_v14 }
 0xe0d   : > { %v2969_v18 = vpop.f32.mrf.mxu0 }
 0xe0e   : > { %v2683_v16 = vmul.f32 -1.442695, %v1989_v15 }
 0xe0f   : > { %v1991_v17 = vpop.f32.mrf.mxu0 }
 0xe10   : > { %3210 = vpow2.f32 %v2683_v16 }
 0xe11   : > { %v2970_v20 = vpop.f32.mrf.mxu0 }
 0xe1d   : > { %v3211_v21 = vpop.eup %3210 }
 0xe1e   : > { %v1997_v22 = vadd.f32 1.0, %v3211_v21 }
 0xe20   : > { %3212 = vrcp.f32 %v1997_v22 }
 0xe2b   : > { %v2805_v23 = vpop.f32.mrf.mxu0 }
 0xe2d   : > { %v2806_v25 = vpop.f32.mrf.mxu0  ;;  %v3213_v30 = vpop.eup %3212 }
 0xe2e   : > { %v2807_v26 = vadd.f32 %v2806_v25, %v2805_v23 }
 0xe2f   : > { %v2808_v27 = vpop.f32.mrf.mxu0 }
 0xe30   : > { %v2339_v29 = vadd.f32 %v2807_v26, %v2700_v24 }
 0xe31   : > { %v2809_v31 = vpop.f32.mrf.mxu0 }
 0xe32   : > { %v2344_v32 = vmul.f32 %v3213_v30, %v2339_v29 }
 0xe34   : > { %v2345_v59 = vadd.f32 %v3216_v33, %v2344_v32 }
 0xe36   : > { %2348 = vadd.xlane.f32.xlu1 %v2345_v59 }
 0xebf   : > { %v2349_v35 = vpop.xlane.xlu1 %2348 }
 0xec0   : > { %v2350_v36 = vmul.f32 0.0078125, %v2349_v35 }
 0xec2   : > { %v2351_v0 = vsub.f32 %v2345_v59, %v2350_v36 }
 0xec4   : > { %v2352_v37 = vmul.f32 %v2351_v0, %v2351_v0 }
 0xec6   : > { %2353 = vadd.xlane.f32.xlu1 %v2352_v37 }
 0xec7   : > { %3468 = shalt.err (!%p3465_p6)
}
 0xec8   : > { %s3469_s24 = scalar_lea.hbm %s2392_s12, 128  ;;  %s3473_s22 = scalar_lea.hbm %s4288_s6, 256 }
 0xec9   : > { %p3470_p8 = scmp.ne.s32.totalorder %s2392_s12, %s3469_s24  ;;  %p3474_p0 = scmp.lt.s32.totalorder %s2392_s12, %s4288_s6 }
 0xeca   : > { %p3475_p2 = scmp.lt.s32.totalorder %s3473_s22, %s3469_s24 }
 0xecb   : > { %p3471_p11 = pnand %p3470_p8, %p4289_p12 }
 0xecc   : > { %p3476_p5 = por %p3475_p2, %p3474_p0 }
 0xecd   : > { %p3472_p13 = pneg %p3471_p11 }
 0xecf   : > { %p3477_p7 = pnand %p3476_p5, %p3472_p13 }
 0xed1   : > { %3480 = shalt.err (!%p3477_p7)
}
 0xed2   : > { %3003 = dma.vmem_to_hbm [thread:$0]  (%p4289_p12), %s2395_s26, 128, %s2392_s12, %s2376_s18  }
 0xed3   : > { %s4290_s0 = sld [smem:[#allocation44_spill]]  ;;  %s820_s16 = scalar_lea.vmem [#allocation18], %s3924_s2 }
 0xed4   : > { %s4291_s24 = sld [smem:[#allocation45_spill]]  ;;  %s2407_s1 = sshll.u32 %s820_s16, 4  ;;  %s2408_s1 = int_to_ptr.vmem [resolvable:$true] %s2407_s1 }
 0xed5   : > { %s4292_s18 = sld [smem:[#allocation47_spill]]  ;;  %s2381_s3 = scalar_lea.sflag [#allocation19], %s3921_s20 }
 0xed6   : > { %s3481_s19 = scalar_lea.vmem %s2408_s1, 128  ;;  %s3591_s4 = smov [#allocation18]  }
 0xed7   : > { %p3482_p1 = scmp.ne.s32.totalorder %s2408_s1, %s3481_s19  ;;  %s3485_s23 = sshll.u32 %s3591_s4, 4  ;;  %s3486_s23 = int_to_ptr.vmem [resolvable:$false] %s3485_s23 }
 0xed8   : > { %s3487_s2 = scalar_lea.vmem %s3486_s23, 256  ;;  %p3488_p10 = scmp.lt.s32.totalorder %s2408_s1, %s3486_s23 }
 0xed9   : > { %v2717_v42 = vld [vmem:[%s4290_s0] ss:$0 sm:$0xff]  ;;  %p3483_p3 = pnand %p3482_p1, %p4289_p12  ;;  %p3489_p9 = scmp.lt.s32.totalorder %s3487_s2, %s3481_s19 }
 0xeda   : > { %v2718_v44 = vld [vmem:[%s4291_s24] ss:$0 sm:$0xff] }
 0xedb   : > { %s2405_s22 = scalar_lea.hbm %s4292_s18, %s2721_s5  ;;  %p3484_p4 = pneg %p3483_p3 }
 0xedc   : > { %p3490_p6 = por %p3489_p9, %p3488_p10 }
 0xede   : > { %p3491_p8 = pnand %p3490_p6, %p3484_p4 }
 0xf4f   : > { %v2354_v38 = vpop.xlane.xlu1 %2353 }
 0xf50   : > { %v2355_v39 = vmul.f32 0.0078125, %v2354_v38 }
 0xf52   : > { %v2356_v40 = vadd.f32 1e-05, %v2355_v39 }
 0xf54   : > { %3214 = vrsqrt.f32 %v2356_v40 }
 0xf61   : > { %v3215_v41 = vpop.eup %3214 }
 0xf62   : > { %v2358_v43 = vmul.f32 %v3215_v41, %v2351_v0 }
 0xf64   : > { %v2365_v45 = vmul.f32 %v2717_v42, %v2358_v43 }
 0xf66   : > { %v2372_v46 = vadd.f32 %v2718_v44, %v2365_v45 }
 0xf68   : > { %2374 = vst [vmem:[%s820_s16] sm:$0xff] %v2372_v46 }
 0xf69   : > { %3494 = shalt.err (!%p3491_p8)
}
 0xf6a   : > { %s3495_s29 = scalar_lea.hbm %s2405_s22, 128  ;;  %s3499_s0 = scalar_lea.hbm %s4292_s18, 256 }
 0xf6b   : > { %p3496_p11 = scmp.ne.s32.totalorder %s2405_s22, %s3495_s29  ;;  %p3500_p2 = scmp.lt.s32.totalorder %s2405_s22, %s4292_s18 }
 0xf6c   : > { %p3501_p5 = scmp.lt.s32.totalorder %s3499_s0, %s3495_s29 }
 0xf6d   : > { %p3497_p13 = pnand %p3496_p11, %p4289_p12 }
 0xf6e   : > { %p3502_p7 = por %p3501_p5, %p3500_p2 }
 0xf6f   : > { %p3498_p0 = pneg %p3497_p13 }
 0xf71   : > { %p3503_p1 = pnand %p3502_p7, %p3498_p0 }
 0xf73   : > { %3506 = shalt.err (!%p3503_p1)
}
 0xf74   : > { %3004 = dma.vmem_to_hbm [thread:$0]  (%p4289_p12), %s2408_s1, 128, %s2405_s22, %s2381_s3  }
 0xf75 PF: > { %s4293_s24 = sld [smem:[#allocation28_spill]]  ;;  %p4296_p4 = scmp.ge.s32.totalorder %s3569_s27, 2 }
 0xf76   : > { %s4294_s16 = sld [smem:[#allocation32_spill]] }
 0xf7b   : > { %s2419_s12 = sand.u32 1, %s4293_s24  }
 0xf7c   : > { %p4295_p3 = scmp.ne.s32.totalorder %s4294_s16, 0  ;;  %s2420_s26 = scalar_lea.sflag [#allocation4], %s2419_s12 }
 0xf7e   : > { %p3037_p10 = pnand %p4296_p4, %p4295_p3 }
 0xf80   : > { %p3038_p9 = pneg %p3037_p10 }
 0xf82   : > { %3548 = dma.done.wait (%p3038_p9), %s2420_s26, 128  }
 0xf83   : > { %3550 = vsyncadd (%p3038_p9), %s2420_s26, 4294967168  ;;  %s2429_s19 = scalar_lea.sflag [#allocation19], %s2419_s12 }
 0xf84   : > { %3552 = dma.done.wait (%p3038_p9), %s2429_s19, 128  }
 0xf85   : > { %3554 = vsyncadd (%p3038_p9), %s2429_s19, 4294967168  ;;  %s4297_s27 = sld [smem:[#allocation30_spill]]  ;;  %s4300_s2 = smov %s3561_s25 }
 0xf86   : > { %s4298_s4 = sld [smem:[#allocation29_spill]] }
 0xf87   : > { %s4299_s26 = sld [smem:[#allocation31_spill]] }
 0xf8b   : > { %p44_p12 = scmp.ge.s32.totalorder %s4297_s27, 4  }
 0xf8c   : > { %s4301_s25 = smov %s4298_s4 }
 0xf8d   :  { %46 = sbr.rel (!%p44_p12) target bundleno = 28 (0x1c), region = 203 }
 0xf92   :  { %2434 = vsyncpa [#allocation3], 1 }
 0xf93   :  { %2436 = vsyncpa [#allocation3 + $0x1], 1 }
 0xf94   :  { %2437 = vsyncpa [#allocation6], 1 }
 0xf95   :  { %2439 = vsyncpa [#allocation6 + $0x1], 1 }
 0xf96   :  { %2440 = vsyncpa [#allocation9], 1 }
 0xf97   :  { %2441 = vsyncpa [#allocation12], 1 }
 0xf98   :  { %2442 = vsyncpa [#allocation15], 1 }
 0xf99   :  { %2443 = vsyncpa [#allocation4], 1 }
 0xf9a   :  { %2445 = vsyncpa [#allocation4 + $0x1], 1 }
 0xf9b   :  { %2446 = vsyncpa [#allocation19], 1 }
 0xf9c   :  { %2448 = vsyncpa [#allocation19 + $0x1], 1 }

</bundles_post_ra>
